<compile_context>
chip_gen: v6e
topology: v6e:2x2x1
jax: 0.10.0
libtpu: 0.0.40
codegen_flags: <defaults>
</compile_context>

<pallas_src>
import jax
import jax.numpy as jnp
from jax.experimental import pallas as pl
from jax.experimental.pallas import tpu as pltpu


def _ds(start, size, stride=1):
    # plain slice when stride==1, strided ref slice otherwise
    return pl.ds(start, size) if stride == 1 else pl.ds(start, size, stride)


# ----------------------------- fused Pallas kernel -----------------------------

def _make_fused_kernel(*, s1, s2, Ho1, Wo1, Ho2, Wo2, Cin, C1, C2,
                       downsample, compute_dtype):
    """Fused conv1+bn1+relu -> conv2+bn2 -> (+identity) -> relu for one image."""
    K = 3  # both main-path convs are 3x3, padding 1

    def kernel(xw_ref, w1_ref, b1_ref, w2_ref, b2_ref, *rest):
        if downsample:
            wd_ref, bd_ref, o_ref, acc1_ref, acc2_ref, out1_ref = rest
        else:
            o_ref, acc1_ref, acc2_ref, out1_ref = rest

        # ---- conv1 (3x3, stride s1, pad=1 pre-applied) + bn1(scale folded) + relu
        # kw taps pre-folded into the channel axis => 3 matmuls with K = 3*Cin.
        for kh in range(K):
            tap = xw_ref[_ds(kh, Ho1, s1), :, :]                       # (Ho1, Wo1, 3*Cin)
            contrib = jnp.dot(
                tap.reshape(Ho1 * Wo1, 3 * Cin).astype(compute_dtype),
                w1_ref[kh],
                preferred_element_type=jnp.float32)
            if kh == 0:
                acc1_ref[...] = contrib
            else:
                acc1_ref[...] += contrib

        # out1 stays resident in VMEM with a 1-px zero border (= conv2's pad=1).
        # Only the thin border ring is zeroed; the interior is fully overwritten.
        Hs, Ws = Ho1 + 2, Wo1 + 2
        out1_ref[pl.ds(0, 1), :, :] = jnp.zeros((1, Ws, C1), jnp.float32)
        out1_ref[pl.ds(Hs - 1, 1), :, :] = jnp.zeros((1, Ws, C1), jnp.float32)
        out1_ref[:, pl.ds(0, 1), :] = jnp.zeros((Hs, 1, C1), jnp.float32)
        out1_ref[:, pl.ds(Ws - 1, 1), :] = jnp.zeros((Hs, 1, C1), jnp.float32)

        out1 = jnp.maximum(acc1_ref[...] + b1_ref[...], 0.0)
        out1_ref[pl.ds(1, Ho1), pl.ds(1, Wo1), :] = out1.reshape(Ho1, Wo1, C1)

        # ---- conv2 (3x3, stride s2, pad=1) + bn2(scale folded)
        first = True
        for kh in range(K):
            for kw in range(K):
                tap = out1_ref[_ds(kh, Ho2, s2), _ds(kw, Wo2, s2), :]  # (Ho2, Wo2, C1)
                contrib = jnp.dot(
                    tap.reshape(Ho2 * Wo2, C1).astype(compute_dtype),
                    w2_ref[kh * K + kw],
                    preferred_element_type=jnp.float32)
                if first:
                    acc2_ref[...] = contrib
                    first = False
                else:
                    acc2_ref[...] += contrib

        # ---- identity path
        if downsample:
            # 1x1 conv, stride 2 (hardcoded in the module).  The needed pixels
            # x[2ho, 2wo] are the kw=1 lane block of the folded layout; the down
            # weight is embedded in rows [Cin:2Cin] of a (3*Cin, C2) matrix (other
            # rows zero), so no lane-offset slicing is required.
            sw = 1 if s1 == 2 else 2
            slab = xw_ref[pl.ds(1, Ho2, 2), _ds(0, Wo2, sw), :]        # (Ho2, Wo2, 3*Cin)
            ident = jnp.dot(
                slab.reshape(Ho2 * Wo2, 3 * Cin).astype(compute_dtype),
                wd_ref[...],
                preferred_element_type=jnp.float32) + bd_ref[...]
        else:
            # plain residual add on the VPU (requires s1 == s2 == 1, Cin == C2):
            # the original x is the kw=1 lane block of the folded layout.
            slab = xw_ref[pl.ds(1, Ho2), pl.ds(0, Wo2), :]             # (Ho2, Wo2, 3*Cin)
            ident = slab[:, :, Cin:2 * Cin].reshape(Ho2 * Wo2, Cin).astype(jnp.float32)

        final = jnp.maximum(acc2_ref[...] + b2_ref[...] + ident, 0.0)
        o_ref[...] = final.reshape(Ho2, Wo2, C2).astype(o_ref.dtype)

    return kernel


# ------------------------------ host-side helpers -------------------------------

def _fold_conv_bn(w_oihw, bn, compute_dtype, eps=1e-5):
    """(Cout,Cin,kh,kw) conv weight + eval-mode BN -> (kh, kw, Cin, Cout) folded
    weight (compute dtype) plus a (1, Cout) f32 bias.  Fold is done in f32."""
    gamma, beta, mean, var = bn
    scale = gamma / jnp.sqrt(var + eps)
    bias = beta - mean * scale
    w = jnp.transpose(w_oihw, (2, 3, 1, 0)) * scale          # (kh, kw, Cin, Cout)
    return w.astype(compute_dtype), bias.reshape(1, -1).astype(jnp.float32)


def basic_block_forward(x_nchw, params, stride_1, stride_2, downsample,
                        *, compute_dtype=jnp.bfloat16):
    s1, s2 = int(stride_1), int(stride_2)
    x = jnp.transpose(x_nchw, (0, 2, 3, 1)).astype(jnp.float32)   # NCHW -> NHWC
    N, H, W, Cin = x.shape
    C1 = params['conv1'].shape[0]
    C2 = params['conv2'].shape[0]
    assert params['conv2'].shape[1] == C1, "conv2 in-channels must equal conv1 out-channels"

    # output spatial sizes (3x3 convs, pad=1)
    Ho1 = (H - 1) // s1 + 1
    Wo1 = (W - 1) // s1 + 1
    Ho2 = (Ho1 - 1) // s2 + 1
    Wo2 = (Wo1 - 1) // s2 + 1

    if downsample:
        Hod = (H - 1) // 2 + 1                       # 1x1 conv, stride 2, pad 0
        Wod = (W - 1) // 2 + 1
        assert (Hod, Wod) == (Ho2, Wo2), "residual and main-path spatial shapes differ"
        assert params['conv_down'].shape[1] == Cin, "conv_down in-channels must match x"
        assert s1 in (1, 2)
    else:
        assert s1 == 1 and s2 == 1 and Cin == C2 and (Ho2, Wo2) == (H, W), \
            "identity add needs matching shapes (PyTorch would also fail here)"

    # 1-px spatial pad, then fold the 3 kw taps into the channel axis:
    #   xw[n, h, wo, kw*Cin + c] = xpad[n, h, wo*s1 + kw, c]
    # Real (unpadded) channels only -> no 32x DMA inflation; all in-kernel W
    # slices for conv1 / downsample become contiguous.
    xp = jnp.pad(x, ((0, 0), (1, 1), (1, 1), (0, 0)))
    Hp = H + 2
    xw = jnp.stack(
        [xp[:, :, kw: kw + (Wo1 - 1) * s1 + 1: s1, :] for kw in range(3)],
        axis=3).reshape(N, Hp, Wo1, 3 * Cin).astype(jnp.float32)

    w1, b1 = _fold_conv_bn(params['conv1'], params['bn1'], compute_dtype)
    w1 = w1.reshape(3, 3 * Cin, C1)                  # kw folded into K
    w2, b2 = _fold_conv_bn(params['conv2'], params['bn2'], compute_dtype)
    w2 = w2.reshape(9, C1, C2)

    inputs = [xw, w1, b1, w2, b2]
    in_specs = [
        pl.BlockSpec((None, Hp, Wo1, 3 * Cin), lambda n: (n, 0, 0, 0)),  # per-image block
        pl.BlockSpec((3, 3 * Cin, C1), lambda n: (0, 0, 0)),             # conv1 weights
        pl.BlockSpec((1, C1), lambda n: (0, 0)),                         # bn1 bias
        pl.BlockSpec((9, C1, C2), lambda n: (0, 0, 0)),                  # conv2 weights
        pl.BlockSpec((1, C2), lambda n: (0, 0)),                         # bn2 bias
    ]
    flops = 2 * N * (Ho1 * Wo1 * 9 * Cin * C1 + Ho2 * Wo2 * 9 * C1 * C2)

    if downsample:
        wd, bd = _fold_conv_bn(params['conv_down'], params['bn_down'], compute_dtype)
        wd = wd.reshape(Cin, C2)
        wd = jnp.pad(wd, ((Cin, Cin), (0, 0)))       # embed as the kw=1 block
        inputs += [wd, bd]
        in_specs += [
            pl.BlockSpec((3 * Cin, C2), lambda n: (0, 0)),               # down weights
            pl.BlockSpec((1, C2), lambda n: (0, 0)),                     # bn_down bias
        ]
        flops += 2 * N * Ho2 * Wo2 * Cin * C2

    kernel = _make_fused_kernel(s1=s1, s2=s2, Ho1=Ho1, Wo1=Wo1, Ho2=Ho2, Wo2=Wo2,
                                Cin=Cin, C1=C1, C2=C2,
                                downsample=downsample, compute_dtype=compute_dtype)

    out_bytes = N * Ho2 * Wo2 * C2 * 4
    bytes_accessed = out_bytes + sum(int(a.size) * a.dtype.itemsize for a in inputs)

    out_nhwc = pl.pallas_call(
        kernel,
        grid=(N,),                                   # pipelined, megacore-parallel
        in_specs=in_specs,
        out_specs=pl.BlockSpec((None, Ho2, Wo2, C2), lambda n: (n, 0, 0, 0)),
        out_shape=jax.ShapeDtypeStruct((N, Ho2, Wo2, C2), jnp.float32),
        scratch_shapes=[
            pltpu.VMEM((Ho1 * Wo1, C1), jnp.float32),          # conv1 accumulator
            pltpu.VMEM((Ho2 * Wo2, C2), jnp.float32),          # conv2 accumulator
            pltpu.VMEM((Ho1 + 2, Wo1 + 2, C1), jnp.float32),   # out1 with zero border
        ],
        compiler_params=pltpu.CompilerParams(
            dimension_semantics=("parallel",),
            # tiny per-step working set here; kept <= 48 MiB for v7x headroom
            vmem_limit_bytes=32 * 1024 * 1024,
        ),
        cost_estimate=pl.CostEstimate(
            flops=int(flops), transcendentals=0, bytes_accessed=int(bytes_accessed)),
    )(*inputs)

    # real channels only are written; transpose exists just to match the NCHW API
    return jnp.transpose(out_nhwc, (0, 3, 1, 2))     # NHWC -> NCHW


# ------------------------------ pure-JAX reference ------------------------------

def _ref_forward(x_nchw, params, stride_1, stride_2, downsample):
    def conv(x, w, stride, pad):
        return jax.lax.conv_general_dilated(
            x, jnp.transpose(w, (2, 3, 1, 0)), (stride, stride),
            [(pad, pad), (pad, pad)],
            dimension_numbers=('NHWC', 'HWIO', 'NHWC'))

    def bn(x, g, b, m, v, eps=1e-5):
        return (x - m) / jnp.sqrt(v + eps) * g + b

    x = jnp.transpose(x_nchw, (0, 2, 3, 1))
    out = jax.nn.relu(bn(conv(x, params['conv1'], stride_1, 1), *params['bn1']))
    out = bn(conv(out, params['conv2'], stride_2, 1), *params['bn2'])
    if downsample:
        ident = bn(conv(x, params['conv_down'], 2, 0), *params['bn_down'])
    else:
        ident = x
    out = jax.nn.relu(out + ident)
    return jnp.transpose(out, (0, 3, 1, 2))


# ------------------------------------- main --------------------------------------

if __name__ == "__main__":
    key = jax.random.PRNGKey(0)
    ks = jax.random.split(key, 4)

    # Basic_block(in_ch_1=4, out_ch_1=8, in_ch_2=8, out_ch_2=8,
    #             stride_1=2, stride_2=1, downsample=True)
    N, Cin, H, W = 2, 4, 16, 16
    C1, C2 = 8, 8
    stride_1, stride_2 = 2, 1
    downsample = True

    def bn_params(c, i):
        gamma = 1.0 + 0.1 * jnp.arange(c, dtype=jnp.float32)
        beta = 0.01 * (i + 1) * jnp.arange(c, dtype=jnp.float32)
        mean = 0.05 * jnp.arange(c, dtype=jnp.float32)
        var = 1.0 + 0.02 * jnp.arange(c, dtype=jnp.float32)
        return (gamma, beta, mean, var)

    params = {
        'conv1': 0.1 * jax.random.normal(ks[0], (C1, Cin, 3, 3), jnp.float32),
        'bn1': bn_params(C1, 0),
        'conv2': 0.1 * jax.random.normal(ks[1], (C2, C1, 3, 3), jnp.float32),
        'bn2': bn_params(C2, 1),
        'conv_down': 0.1 * jax.random.normal(ks[2], (C2, C2 // 2, 1, 1), jnp.float32),
        'bn_down': bn_params(C2, 2),
    }

    x = jax.random.normal(ks[3], (N, Cin, H, W), jnp.float32)

    ref = _ref_forward(x, params, stride_1, stride_2, downsample)

    # 1) exact-precision configuration (f32 MXU inputs) -> tight tolerance
    out_f32 = jax.block_until_ready(
        basic_block_forward(x, params, stride_1, stride_2, downsample,
                            compute_dtype=jnp.float32))
    assert out_f32.shape == ref.shape, (out_f32.shape, ref.shape)
    assert jnp.allclose(out_f32, ref, atol=1e-4, rtol=1e-4), \
        float(jnp.abs(out_f32 - ref).max())

    # 2) performance configuration (bf16 MXU inputs, f32 accumulation/epilogue);
    #    tolerance sized for bf16 rounding of activations/weights.
    out_bf16 = jax.block_until_ready(
        basic_block_forward(x, params, stride_1, stride_2, downsample))
    assert out_bf16.shape == ref.shape, (out_bf16.shape, ref.shape)
    assert jnp.allclose(out_bf16, ref, atol=5e-2, rtol=5e-2), \
        float(jnp.abs(out_bf16 - ref).max())

    print("KERNEL_OK")
</pallas_src>

<mosaic_0001>
module attributes {stable_mosaic.version = 11 : i64} {
  func.func @kernel(%arg0: i32, %arg1: memref<1x18x8x12xf32, #tpu.memory_space<vmem>>, %arg2: memref<3x12x8xf32, #tpu.memory_space<vmem>>, %arg3: memref<1x8xf32, #tpu.memory_space<vmem>>, %arg4: memref<9x8x8xf32, #tpu.memory_space<vmem>>, %arg5: memref<1x8xf32, #tpu.memory_space<vmem>>, %arg6: memref<12x8xf32, #tpu.memory_space<vmem>>, %arg7: memref<1x8xf32, #tpu.memory_space<vmem>>, %arg8: memref<1x8x8x8xf32, #tpu.memory_space<vmem>>, %arg9: memref<64x8xf32, #tpu.memory_space<vmem>>, %arg10: memref<64x8xf32, #tpu.memory_space<vmem>>, %arg11: memref<10x10x8xf32, #tpu.memory_space<vmem>>) attributes {dimension_semantics = [#tpu.dimension_semantics<parallel>], iteration_bounds = array<i64: 2>, scalar_prefetch = 0 : i64, scratch_operands = 3 : i64, tpu.core_type = #tpu.core_type<tc>, window_params = [{transform_indices = @transform_0, window_bounds = array<i64: 1, 18, 8, 12>}, {pipeline_mode = #tpu.pipeline_mode<synchronous>, transform_indices = @transform_1, window_bounds = array<i64: 3, 12, 8>}, {pipeline_mode = #tpu.pipeline_mode<synchronous>, transform_indices = @transform_2, window_bounds = array<i64: 1, 8>}, {pipeline_mode = #tpu.pipeline_mode<synchronous>, transform_indices = @transform_3, window_bounds = array<i64: 9, 8, 8>}, {pipeline_mode = #tpu.pipeline_mode<synchronous>, transform_indices = @transform_4, window_bounds = array<i64: 1, 8>}, {pipeline_mode = #tpu.pipeline_mode<synchronous>, transform_indices = @transform_5, window_bounds = array<i64: 12, 8>}, {pipeline_mode = #tpu.pipeline_mode<synchronous>, transform_indices = @transform_6, window_bounds = array<i64: 1, 8>}, {transform_indices = @transform_7, window_bounds = array<i64: 1, 8, 8, 8>}]} {
    %c0 = arith.constant 0 : index
    %c0_0 = arith.constant 0 : index
    %c0_1 = arith.constant 0 : index
    %c0_2 = arith.constant 0 : index
    %0 = tpu.strided_load %arg1[%c0, %c0_0, %c0_1, %c0_2] {strides = array<i32: 1, 2, 1, 1>} : memref<1x18x8x12xf32, #tpu.memory_space<vmem>>, vector<1x8x8x12xf32>
    %1 = vector.shape_cast %0 : vector<1x8x8x12xf32> to vector<8x8x12xf32>
    %2 = vector.shape_cast %1 : vector<8x8x12xf32> to vector<64x12xf32>
    %c0_3 = arith.constant 0 : index
    %c0_4 = arith.constant 0 : index
    %c0_5 = arith.constant 0 : index
    %3 = vector.load %arg2[%c0_3, %c0_4, %c0_5] : memref<3x12x8xf32, #tpu.memory_space<vmem>>, vector<1x12x8xf32>
    %4 = vector.shape_cast %3 : vector<1x12x8xf32> to vector<12x8xf32>
    %cst = arith.constant dense<0.000000e+00> : vector<64x8xf32>
    %5 = tpu.matmul %2, %4, %cst {dimension_numbers = #tpu.dot_dimension_numbers<[1], [0], [0], [1], [0, 0, 1, 1], [], []>} : vector<64x12xf32>, vector<12x8xf32>, vector<64x8xf32> -> vector<64x8xf32>
    %c0_6 = arith.constant 0 : index
    %c0_7 = arith.constant 0 : index
    %6 = vector.load %arg9[%c0_6, %c0_7] : memref<64x8xf32, #tpu.memory_space<vmem>>, vector<64x8xf32>
    tpu.vector_store %arg9[%c0_6, %c0_7], %5 {strides = array<i32>} : memref<64x8xf32, #tpu.memory_space<vmem>>, vector<64x8xf32>,
    %c0_8 = arith.constant 0 : index
    %c1 = arith.constant 1 : index
    %c0_9 = arith.constant 0 : index
    %c0_10 = arith.constant 0 : index
    %7 = tpu.strided_load %arg1[%c0_8, %c1, %c0_9, %c0_10] {strides = array<i32: 1, 2, 1, 1>} : memref<1x18x8x12xf32, #tpu.memory_space<vmem>>, vector<1x8x8x12xf32>
    %8 = vector.shape_cast %7 : vector<1x8x8x12xf32> to vector<8x8x12xf32>
    %9 = vector.shape_cast %8 : vector<8x8x12xf32> to vector<64x12xf32>
    %c1_11 = arith.constant 1 : index
    %c0_12 = arith.constant 0 : index
    %c0_13 = arith.constant 0 : index
    %10 = vector.load %arg2[%c1_11, %c0_12, %c0_13] : memref<3x12x8xf32, #tpu.memory_space<vmem>>, vector<1x12x8xf32>
    %11 = vector.shape_cast %10 : vector<1x12x8xf32> to vector<12x8xf32>
    %cst_14 = arith.constant dense<0.000000e+00> : vector<64x8xf32>
    %12 = tpu.matmul %9, %11, %cst_14 {dimension_numbers = #tpu.dot_dimension_numbers<[1], [0], [0], [1], [0, 0, 1, 1], [], []>} : vector<64x12xf32>, vector<12x8xf32>, vector<64x8xf32> -> vector<64x8xf32>
    %c0_15 = arith.constant 0 : index
    %c0_16 = arith.constant 0 : index
    %13 = vector.load %arg9[%c0_15, %c0_16] : memref<64x8xf32, #tpu.memory_space<vmem>>, vector<64x8xf32>
    %14 = arith.addf %13, %12 : vector<64x8xf32>
    %c0_17 = arith.constant 0 : index
    %c0_18 = arith.constant 0 : index
    %15 = vector.load %arg9[%c0_17, %c0_18] : memref<64x8xf32, #tpu.memory_space<vmem>>, vector<64x8xf32>
    tpu.vector_store %arg9[%c0_17, %c0_18], %14 {strides = array<i32>} : memref<64x8xf32, #tpu.memory_space<vmem>>, vector<64x8xf32>,
    %c0_19 = arith.constant 0 : index
    %c2 = arith.constant 2 : index
    %c0_20 = arith.constant 0 : index
    %c0_21 = arith.constant 0 : index
    %16 = tpu.strided_load %arg1[%c0_19, %c2, %c0_20, %c0_21] {strides = array<i32: 1, 2, 1, 1>} : memref<1x18x8x12xf32, #tpu.memory_space<vmem>>, vector<1x8x8x12xf32>
    %17 = vector.shape_cast %16 : vector<1x8x8x12xf32> to vector<8x8x12xf32>
    %18 = vector.shape_cast %17 : vector<8x8x12xf32> to vector<64x12xf32>
    %c2_22 = arith.constant 2 : index
    %c0_23 = arith.constant 0 : index
    %c0_24 = arith.constant 0 : index
    %19 = vector.load %arg2[%c2_22, %c0_23, %c0_24] : memref<3x12x8xf32, #tpu.memory_space<vmem>>, vector<1x12x8xf32>
    %20 = vector.shape_cast %19 : vector<1x12x8xf32> to vector<12x8xf32>
    %cst_25 = arith.constant dense<0.000000e+00> : vector<64x8xf32>
    %21 = tpu.matmul %18, %20, %cst_25 {dimension_numbers = #tpu.dot_dimension_numbers<[1], [0], [0], [1], [0, 0, 1, 1], [], []>} : vector<64x12xf32>, vector<12x8xf32>, vector<64x8xf32> -> vector<64x8xf32>
    %c0_26 = arith.constant 0 : index
    %c0_27 = arith.constant 0 : index
    %22 = vector.load %arg9[%c0_26, %c0_27] : memref<64x8xf32, #tpu.memory_space<vmem>>, vector<64x8xf32>
    %23 = arith.addf %22, %21 : vector<64x8xf32>
    %c0_28 = arith.constant 0 : index
    %c0_29 = arith.constant 0 : index
    %24 = vector.load %arg9[%c0_28, %c0_29] : memref<64x8xf32, #tpu.memory_space<vmem>>, vector<64x8xf32>
    tpu.vector_store %arg9[%c0_28, %c0_29], %23 {strides = array<i32>} : memref<64x8xf32, #tpu.memory_space<vmem>>, vector<64x8xf32>,
    %cst_30 = arith.constant 0.000000e+00 : f32
    %25 = vector.broadcast %cst_30 : f32 to vector<1x10x8xf32>
    %c0_31 = arith.constant 0 : index
    %c0_32 = arith.constant 0 : index
    %c0_33 = arith.constant 0 : index
    %26 = vector.load %arg11[%c0_31, %c0_32, %c0_33] : memref<10x10x8xf32, #tpu.memory_space<vmem>>, vector<1x10x8xf32>
    tpu.vector_store %arg11[%c0_31, %c0_32, %c0_33], %25 {strides = array<i32>} : memref<10x10x8xf32, #tpu.memory_space<vmem>>, vector<1x10x8xf32>,
    %cst_34 = arith.constant 0.000000e+00 : f32
    %27 = vector.broadcast %cst_34 : f32 to vector<1x10x8xf32>
    %c9 = arith.constant 9 : index
    %c0_35 = arith.constant 0 : index
    %c0_36 = arith.constant 0 : index
    %28 = vector.load %arg11[%c9, %c0_35, %c0_36] : memref<10x10x8xf32, #tpu.memory_space<vmem>>, vector<1x10x8xf32>
    tpu.vector_store %arg11[%c9, %c0_35, %c0_36], %27 {strides = array<i32>} : memref<10x10x8xf32, #tpu.memory_space<vmem>>, vector<1x10x8xf32>,
    %cst_37 = arith.constant 0.000000e+00 : f32
    %29 = vector.broadcast %cst_37 : f32 to vector<10x1x8xf32>
    %c0_38 = arith.constant 0 : index
    %c0_39 = arith.constant 0 : index
    %c0_40 = arith.constant 0 : index
    %30 = vector.load %arg11[%c0_38, %c0_39, %c0_40] : memref<10x10x8xf32, #tpu.memory_space<vmem>>, vector<10x1x8xf32>
    tpu.vector_store %arg11[%c0_38, %c0_39, %c0_40], %29 {strides = array<i32>} : memref<10x10x8xf32, #tpu.memory_space<vmem>>, vector<10x1x8xf32>,
    %cst_41 = arith.constant 0.000000e+00 : f32
    %31 = vector.broadcast %cst_41 : f32 to vector<10x1x8xf32>
    %c0_42 = arith.constant 0 : index
    %c9_43 = arith.constant 9 : index
    %c0_44 = arith.constant 0 : index
    %32 = vector.load %arg11[%c0_42, %c9_43, %c0_44] : memref<10x10x8xf32, #tpu.memory_space<vmem>>, vector<10x1x8xf32>
    tpu.vector_store %arg11[%c0_42, %c9_43, %c0_44], %31 {strides = array<i32>} : memref<10x10x8xf32, #tpu.memory_space<vmem>>, vector<10x1x8xf32>,
    %c0_45 = arith.constant 0 : index
    %c0_46 = arith.constant 0 : index
    %33 = vector.load %arg9[%c0_45, %c0_46] : memref<64x8xf32, #tpu.memory_space<vmem>>, vector<64x8xf32>
    %c0_47 = arith.constant 0 : index
    %c0_48 = arith.constant 0 : index
    %34 = vector.load %arg3[%c0_47, %c0_48] : memref<1x8xf32, #tpu.memory_space<vmem>>, vector<1x8xf32>
    %35 = vector.broadcast %34 : vector<1x8xf32> to vector<64x8xf32>
    %36 = arith.addf %33, %35 : vector<64x8xf32>
    %cst_49 = arith.constant 0.000000e+00 : f32
    %37 = vector.broadcast %cst_49 : f32 to vector<64x8xf32>
    %38 = arith.maximumf %36, %37 : vector<64x8xf32>
    %39 = vector.shape_cast %38 : vector<64x8xf32> to vector<8x8x8xf32>
    %c1_50 = arith.constant 1 : index
    %c1_51 = arith.constant 1 : index
    %c0_52 = arith.constant 0 : index
    %40 = vector.load %arg11[%c1_50, %c1_51, %c0_52] : memref<10x10x8xf32, #tpu.memory_space<vmem>>, vector<8x8x8xf32>
    tpu.vector_store %arg11[%c1_50, %c1_51, %c0_52], %39 {strides = array<i32>} : memref<10x10x8xf32, #tpu.memory_space<vmem>>, vector<8x8x8xf32>,
    %c0_53 = arith.constant 0 : index
    %c0_54 = arith.constant 0 : index
    %c0_55 = arith.constant 0 : index
    %41 = vector.load %arg11[%c0_53, %c0_54, %c0_55] : memref<10x10x8xf32, #tpu.memory_space<vmem>>, vector<8x8x8xf32>
    %42 = vector.shape_cast %41 : vector<8x8x8xf32> to vector<64x8xf32>
    %c0_56 = arith.constant 0 : index
    %c0_57 = arith.constant 0 : index
    %c0_58 = arith.constant 0 : index
    %43 = vector.load %arg4[%c0_56, %c0_57, %c0_58] : memref<9x8x8xf32, #tpu.memory_space<vmem>>, vector<1x8x8xf32>
    %44 = vector.shape_cast %43 : vector<1x8x8xf32> to vector<8x8xf32>
    %cst_59 = arith.constant dense<0.000000e+00> : vector<64x8xf32>
    %45 = tpu.matmul %42, %44, %cst_59 {dimension_numbers = #tpu.dot_dimension_numbers<[1], [0], [0], [1], [0, 0, 1, 1], [], []>} : vector<64x8xf32>, vector<8x8xf32>, vector<64x8xf32> -> vector<64x8xf32>
    %c0_60 = arith.constant 0 : index
    %c0_61 = arith.constant 0 : index
    %46 = vector.load %arg10[%c0_60, %c0_61] : memref<64x8xf32, #tpu.memory_space<vmem>>, vector<64x8xf32>
    tpu.vector_store %arg10[%c0_60, %c0_61], %45 {strides = array<i32>} : memref<64x8xf32, #tpu.memory_space<vmem>>, vector<64x8xf32>,
    %c0_62 = arith.constant 0 : index
    %c1_63 = arith.constant 1 : index
    %c0_64 = arith.constant 0 : index
    %47 = vector.load %arg11[%c0_62, %c1_63, %c0_64] : memref<10x10x8xf32, #tpu.memory_space<vmem>>, vector<8x8x8xf32>
    %48 = vector.shape_cast %47 : vector<8x8x8xf32> to vector<64x8xf32>
    %c1_65 = arith.constant 1 : index
    %c0_66 = arith.constant 0 : index
    %c0_67 = arith.constant 0 : index
    %49 = vector.load %arg4[%c1_65, %c0_66, %c0_67] : memref<9x8x8xf32, #tpu.memory_space<vmem>>, vector<1x8x8xf32>
    %50 = vector.shape_cast %49 : vector<1x8x8xf32> to vector<8x8xf32>
    %cst_68 = arith.constant dense<0.000000e+00> : vector<64x8xf32>
    %51 = tpu.matmul %48, %50, %cst_68 {dimension_numbers = #tpu.dot_dimension_numbers<[1], [0], [0], [1], [0, 0, 1, 1], [], []>} : vector<64x8xf32>, vector<8x8xf32>, vector<64x8xf32> -> vector<64x8xf32>
    %c0_69 = arith.constant 0 : index
    %c0_70 = arith.constant 0 : index
    %52 = vector.load %arg10[%c0_69, %c0_70] : memref<64x8xf32, #tpu.memory_space<vmem>>, vector<64x8xf32>
    %53 = arith.addf %52, %51 : vector<64x8xf32>
    %c0_71 = arith.constant 0 : index
    %c0_72 = arith.constant 0 : index
    %54 = vector.load %arg10[%c0_71, %c0_72] : memref<64x8xf32, #tpu.memory_space<vmem>>, vector<64x8xf32>
    tpu.vector_store %arg10[%c0_71, %c0_72], %53 {strides = array<i32>} : memref<64x8xf32, #tpu.memory_space<vmem>>, vector<64x8xf32>,
    %c0_73 = arith.constant 0 : index
    %c2_74 = arith.constant 2 : index
    %c0_75 = arith.constant 0 : index
    %55 = vector.load %arg11[%c0_73, %c2_74, %c0_75] : memref<10x10x8xf32, #tpu.memory_space<vmem>>, vector<8x8x8xf32>
    %56 = vector.shape_cast %55 : vector<8x8x8xf32> to vector<64x8xf32>
    %c2_76 = arith.constant 2 : index
    %c0_77 = arith.constant 0 : index
    %c0_78 = arith.constant 0 : index
    %57 = vector.load %arg4[%c2_76, %c0_77, %c0_78] : memref<9x8x8xf32, #tpu.memory_space<vmem>>, vector<1x8x8xf32>
    %58 = vector.shape_cast %57 : vector<1x8x8xf32> to vector<8x8xf32>
    %cst_79 = arith.constant dense<0.000000e+00> : vector<64x8xf32>
    %59 = tpu.matmul %56, %58, %cst_79 {dimension_numbers = #tpu.dot_dimension_numbers<[1], [0], [0], [1], [0, 0, 1, 1], [], []>} : vector<64x8xf32>, vector<8x8xf32>, vector<64x8xf32> -> vector<64x8xf32>
    %c0_80 = arith.constant 0 : index
    %c0_81 = arith.constant 0 : index
    %60 = vector.load %arg10[%c0_80, %c0_81] : memref<64x8xf32, #tpu.memory_space<vmem>>, vector<64x8xf32>
    %61 = arith.addf %60, %59 : vector<64x8xf32>
    %c0_82 = arith.constant 0 : index
    %c0_83 = arith.constant 0 : index
    %62 = vector.load %arg10[%c0_82, %c0_83] : memref<64x8xf32, #tpu.memory_space<vmem>>, vector<64x8xf32>
    tpu.vector_store %arg10[%c0_82, %c0_83], %61 {strides = array<i32>} : memref<64x8xf32, #tpu.memory_space<vmem>>, vector<64x8xf32>,
    %c1_84 = arith.constant 1 : index
    %c0_85 = arith.constant 0 : index
    %c0_86 = arith.constant 0 : index
    %63 = vector.load %arg11[%c1_84, %c0_85, %c0_86] : memref<10x10x8xf32, #tpu.memory_space<vmem>>, vector<8x8x8xf32>
    %64 = vector.shape_cast %63 : vector<8x8x8xf32> to vector<64x8xf32>
    %c3 = arith.constant 3 : index
    %c0_87 = arith.constant 0 : index
    %c0_88 = arith.constant 0 : index
    %65 = vector.load %arg4[%c3, %c0_87, %c0_88] : memref<9x8x8xf32, #tpu.memory_space<vmem>>, vector<1x8x8xf32>
    %66 = vector.shape_cast %65 : vector<1x8x8xf32> to vector<8x8xf32>
    %cst_89 = arith.constant dense<0.000000e+00> : vector<64x8xf32>
    %67 = tpu.matmul %64, %66, %cst_89 {dimension_numbers = #tpu.dot_dimension_numbers<[1], [0], [0], [1], [0, 0, 1, 1], [], []>} : vector<64x8xf32>, vector<8x8xf32>, vector<64x8xf32> -> vector<64x8xf32>
    %c0_90 = arith.constant 0 : index
    %c0_91 = arith.constant 0 : index
    %68 = vector.load %arg10[%c0_90, %c0_91] : memref<64x8xf32, #tpu.memory_space<vmem>>, vector<64x8xf32>
    %69 = arith.addf %68, %67 : vector<64x8xf32>
    %c0_92 = arith.constant 0 : index
    %c0_93 = arith.constant 0 : index
    %70 = vector.load %arg10[%c0_92, %c0_93] : memref<64x8xf32, #tpu.memory_space<vmem>>, vector<64x8xf32>
    tpu.vector_store %arg10[%c0_92, %c0_93], %69 {strides = array<i32>} : memref<64x8xf32, #tpu.memory_space<vmem>>, vector<64x8xf32>,
    %c1_94 = arith.constant 1 : index
    %c1_95 = arith.constant 1 : index
    %c0_96 = arith.constant 0 : index
    %71 = vector.load %arg11[%c1_94, %c1_95, %c0_96] : memref<10x10x8xf32, #tpu.memory_space<vmem>>, vector<8x8x8xf32>
    %72 = vector.shape_cast %71 : vector<8x8x8xf32> to vector<64x8xf32>
    %c4 = arith.constant 4 : index
    %c0_97 = arith.constant 0 : index
    %c0_98 = arith.constant 0 : index
    %73 = vector.load %arg4[%c4, %c0_97, %c0_98] : memref<9x8x8xf32, #tpu.memory_space<vmem>>, vector<1x8x8xf32>
    %74 = vector.shape_cast %73 : vector<1x8x8xf32> to vector<8x8xf32>
    %cst_99 = arith.constant dense<0.000000e+00> : vector<64x8xf32>
    %75 = tpu.matmul %72, %74, %cst_99 {dimension_numbers = #tpu.dot_dimension_numbers<[1], [0], [0], [1], [0, 0, 1, 1], [], []>} : vector<64x8xf32>, vector<8x8xf32>, vector<64x8xf32> -> vector<64x8xf32>
    %c0_100 = arith.constant 0 : index
    %c0_101 = arith.constant 0 : index
    %76 = vector.load %arg10[%c0_100, %c0_101] : memref<64x8xf32, #tpu.memory_space<vmem>>, vector<64x8xf32>
    %77 = arith.addf %76, %75 : vector<64x8xf32>
    %c0_102 = arith.constant 0 : index
    %c0_103 = arith.constant 0 : index
    %78 = vector.load %arg10[%c0_102, %c0_103] : memref<64x8xf32, #tpu.memory_space<vmem>>, vector<64x8xf32>
    tpu.vector_store %arg10[%c0_102, %c0_103], %77 {strides = array<i32>} : memref<64x8xf32, #tpu.memory_space<vmem>>, vector<64x8xf32>,
    %c1_104 = arith.constant 1 : index
    %c2_105 = arith.constant 2 : index
    %c0_106 = arith.constant 0 : index
    %79 = vector.load %arg11[%c1_104, %c2_105, %c0_106] : memref<10x10x8xf32, #tpu.memory_space<vmem>>, vector<8x8x8xf32>
    %80 = vector.shape_cast %79 : vector<8x8x8xf32> to vector<64x8xf32>
    %c5 = arith.constant 5 : index
    %c0_107 = arith.constant 0 : index
    %c0_108 = arith.constant 0 : index
    %81 = vector.load %arg4[%c5, %c0_107, %c0_108] : memref<9x8x8xf32, #tpu.memory_space<vmem>>, vector<1x8x8xf32>
    %82 = vector.shape_cast %81 : vector<1x8x8xf32> to vector<8x8xf32>
    %cst_109 = arith.constant dense<0.000000e+00> : vector<64x8xf32>
    %83 = tpu.matmul %80, %82, %cst_109 {dimension_numbers = #tpu.dot_dimension_numbers<[1], [0], [0], [1], [0, 0, 1, 1], [], []>} : vector<64x8xf32>, vector<8x8xf32>, vector<64x8xf32> -> vector<64x8xf32>
    %c0_110 = arith.constant 0 : index
    %c0_111 = arith.constant 0 : index
    %84 = vector.load %arg10[%c0_110, %c0_111] : memref<64x8xf32, #tpu.memory_space<vmem>>, vector<64x8xf32>
    %85 = arith.addf %84, %83 : vector<64x8xf32>
    %c0_112 = arith.constant 0 : index
    %c0_113 = arith.constant 0 : index
    %86 = vector.load %arg10[%c0_112, %c0_113] : memref<64x8xf32, #tpu.memory_space<vmem>>, vector<64x8xf32>
    tpu.vector_store %arg10[%c0_112, %c0_113], %85 {strides = array<i32>} : memref<64x8xf32, #tpu.memory_space<vmem>>, vector<64x8xf32>,
    %c2_114 = arith.constant 2 : index
    %c0_115 = arith.constant 0 : index
    %c0_116 = arith.constant 0 : index
    %87 = vector.load %arg11[%c2_114, %c0_115, %c0_116] : memref<10x10x8xf32, #tpu.memory_space<vmem>>, vector<8x8x8xf32>
    %88 = vector.shape_cast %87 : vector<8x8x8xf32> to vector<64x8xf32>
    %c6 = arith.constant 6 : index
    %c0_117 = arith.constant 0 : index
    %c0_118 = arith.constant 0 : index
    %89 = vector.load %arg4[%c6, %c0_117, %c0_118] : memref<9x8x8xf32, #tpu.memory_space<vmem>>, vector<1x8x8xf32>
    %90 = vector.shape_cast %89 : vector<1x8x8xf32> to vector<8x8xf32>
    %cst_119 = arith.constant dense<0.000000e+00> : vector<64x8xf32>
    %91 = tpu.matmul %88, %90, %cst_119 {dimension_numbers = #tpu.dot_dimension_numbers<[1], [0], [0], [1], [0, 0, 1, 1], [], []>} : vector<64x8xf32>, vector<8x8xf32>, vector<64x8xf32> -> vector<64x8xf32>
    %c0_120 = arith.constant 0 : index
    %c0_121 = arith.constant 0 : index
    %92 = vector.load %arg10[%c0_120, %c0_121] : memref<64x8xf32, #tpu.memory_space<vmem>>, vector<64x8xf32>
    %93 = arith.addf %92, %91 : vector<64x8xf32>
    %c0_122 = arith.constant 0 : index
    %c0_123 = arith.constant 0 : index
    %94 = vector.load %arg10[%c0_122, %c0_123] : memref<64x8xf32, #tpu.memory_space<vmem>>, vector<64x8xf32>
    tpu.vector_store %arg10[%c0_122, %c0_123], %93 {strides = array<i32>} : memref<64x8xf32, #tpu.memory_space<vmem>>, vector<64x8xf32>,
    %c2_124 = arith.constant 2 : index
    %c1_125 = arith.constant 1 : index
    %c0_126 = arith.constant 0 : index
    %95 = vector.load %arg11[%c2_124, %c1_125, %c0_126] : memref<10x10x8xf32, #tpu.memory_space<vmem>>, vector<8x8x8xf32>
    %96 = vector.shape_cast %95 : vector<8x8x8xf32> to vector<64x8xf32>
    %c7 = arith.constant 7 : index
    %c0_127 = arith.constant 0 : index
    %c0_128 = arith.constant 0 : index
    %97 = vector.load %arg4[%c7, %c0_127, %c0_128] : memref<9x8x8xf32, #tpu.memory_space<vmem>>, vector<1x8x8xf32>
    %98 = vector.shape_cast %97 : vector<1x8x8xf32> to vector<8x8xf32>
    %cst_129 = arith.constant dense<0.000000e+00> : vector<64x8xf32>
    %99 = tpu.matmul %96, %98, %cst_129 {dimension_numbers = #tpu.dot_dimension_numbers<[1], [0], [0], [1], [0, 0, 1, 1], [], []>} : vector<64x8xf32>, vector<8x8xf32>, vector<64x8xf32> -> vector<64x8xf32>
    %c0_130 = arith.constant 0 : index
    %c0_131 = arith.constant 0 : index
    %100 = vector.load %arg10[%c0_130, %c0_131] : memref<64x8xf32, #tpu.memory_space<vmem>>, vector<64x8xf32>
    %101 = arith.addf %100, %99 : vector<64x8xf32>
    %c0_132 = arith.constant 0 : index
    %c0_133 = arith.constant 0 : index
    %102 = vector.load %arg10[%c0_132, %c0_133] : memref<64x8xf32, #tpu.memory_space<vmem>>, vector<64x8xf32>
    tpu.vector_store %arg10[%c0_132, %c0_133], %101 {strides = array<i32>} : memref<64x8xf32, #tpu.memory_space<vmem>>, vector<64x8xf32>,
    %c2_134 = arith.constant 2 : index
    %c2_135 = arith.constant 2 : index
    %c0_136 = arith.constant 0 : index
    %103 = vector.load %arg11[%c2_134, %c2_135, %c0_136] : memref<10x10x8xf32, #tpu.memory_space<vmem>>, vector<8x8x8xf32>
    %104 = vector.shape_cast %103 : vector<8x8x8xf32> to vector<64x8xf32>
    %c8 = arith.constant 8 : index
    %c0_137 = arith.constant 0 : index
    %c0_138 = arith.constant 0 : index
    %105 = vector.load %arg4[%c8, %c0_137, %c0_138] : memref<9x8x8xf32, #tpu.memory_space<vmem>>, vector<1x8x8xf32>
    %106 = vector.shape_cast %105 : vector<1x8x8xf32> to vector<8x8xf32>
    %cst_139 = arith.constant dense<0.000000e+00> : vector<64x8xf32>
    %107 = tpu.matmul %104, %106, %cst_139 {dimension_numbers = #tpu.dot_dimension_numbers<[1], [0], [0], [1], [0, 0, 1, 1], [], []>} : vector<64x8xf32>, vector<8x8xf32>, vector<64x8xf32> -> vector<64x8xf32>
    %c0_140 = arith.constant 0 : index
    %c0_141 = arith.constant 0 : index
    %108 = vector.load %arg10[%c0_140, %c0_141] : memref<64x8xf32, #tpu.memory_space<vmem>>, vector<64x8xf32>
    %109 = arith.addf %108, %107 : vector<64x8xf32>
    %c0_142 = arith.constant 0 : index
    %c0_143 = arith.constant 0 : index
    %110 = vector.load %arg10[%c0_142, %c0_143] : memref<64x8xf32, #tpu.memory_space<vmem>>, vector<64x8xf32>
    tpu.vector_store %arg10[%c0_142, %c0_143], %109 {strides = array<i32>} : memref<64x8xf32, #tpu.memory_space<vmem>>, vector<64x8xf32>,
    %c0_144 = arith.constant 0 : index
    %c1_145 = arith.constant 1 : index
    %c0_146 = arith.constant 0 : index
    %c0_147 = arith.constant 0 : index
    %111 = tpu.strided_load %arg1[%c0_144, %c1_145, %c0_146, %c0_147] {strides = array<i32: 1, 2, 1, 1>} : memref<1x18x8x12xf32, #tpu.memory_space<vmem>>, vector<1x8x8x12xf32>
    %112 = vector.shape_cast %111 : vector<1x8x8x12xf32> to vector<8x8x12xf32>
    %113 = vector.shape_cast %112 : vector<8x8x12xf32> to vector<64x12xf32>
    %c0_148 = arith.constant 0 : index
    %c0_149 = arith.constant 0 : index
    %114 = vector.load %arg6[%c0_148, %c0_149] : memref<12x8xf32, #tpu.memory_space<vmem>>, vector<12x8xf32>
    %cst_150 = arith.constant dense<0.000000e+00> : vector<64x8xf32>
    %115 = tpu.matmul %113, %114, %cst_150 {dimension_numbers = #tpu.dot_dimension_numbers<[1], [0], [0], [1], [0, 0, 1, 1], [], []>} : vector<64x12xf32>, vector<12x8xf32>, vector<64x8xf32> -> vector<64x8xf32>
    %c0_151 = arith.constant 0 : index
    %c0_152 = arith.constant 0 : index
    %116 = vector.load %arg7[%c0_151, %c0_152] : memref<1x8xf32, #tpu.memory_space<vmem>>, vector<1x8xf32>
    %117 = vector.broadcast %116 : vector<1x8xf32> to vector<64x8xf32>
    %118 = arith.addf %115, %117 : vector<64x8xf32>
    %c0_153 = arith.constant 0 : index
    %c0_154 = arith.constant 0 : index
    %119 = vector.load %arg10[%c0_153, %c0_154] : memref<64x8xf32, #tpu.memory_space<vmem>>, vector<64x8xf32>
    %c0_155 = arith.constant 0 : index
    %c0_156 = arith.constant 0 : index
    %120 = vector.load %arg5[%c0_155, %c0_156] : memref<1x8xf32, #tpu.memory_space<vmem>>, vector<1x8xf32>
    %121 = vector.broadcast %120 : vector<1x8xf32> to vector<64x8xf32>
    %122 = arith.addf %119, %121 : vector<64x8xf32>
    %123 = arith.addf %122, %118 : vector<64x8xf32>
    %cst_157 = arith.constant 0.000000e+00 : f32
    %124 = vector.broadcast %cst_157 : f32 to vector<64x8xf32>
    %125 = arith.maximumf %123, %124 : vector<64x8xf32>
    %126 = vector.shape_cast %125 : vector<64x8xf32> to vector<8x8x8xf32>
    %c0_158 = arith.constant 0 : index
    %c0_159 = arith.constant 0 : index
    %c0_160 = arith.constant 0 : index
    %c0_161 = arith.constant 0 : index
    %127 = vector.load %arg8[%c0_158, %c0_159, %c0_160, %c0_161] : memref<1x8x8x8xf32, #tpu.memory_space<vmem>>, vector<1x8x8x8xf32>
    %128 = vector.shape_cast %127 : vector<1x8x8x8xf32> to vector<8x8x8xf32>
    %129 = vector.shape_cast %126 : vector<8x8x8xf32> to vector<1x8x8x8xf32>
    tpu.vector_store %arg8[%c0_158, %c0_159, %c0_160, %c0_161], %129 {strides = array<i32>} : memref<1x8x8x8xf32, #tpu.memory_space<vmem>>, vector<1x8x8x8xf32>,
    return
  }
  func.func @transform_0(%arg0: i32) -> (i32, i32, i32, i32) {
    %c0_i32 = arith.constant 0 : i32
    %c0_i32_0 = arith.constant 0 : i32
    %c0_i32_1 = arith.constant 0 : i32
    %c0_i32_2 = arith.constant 0 : i32
    return %arg0, %c0_i32, %c0_i32_0, %c0_i32_1 : i32, i32, i32, i32
  }
  func.func @transform_1(%arg0: i32) -> (i32, i32, i32) {
    %c0_i32 = arith.constant 0 : i32
    %c0_i32_0 = arith.constant 0 : i32
    %c0_i32_1 = arith.constant 0 : i32
    %c0_i32_2 = arith.constant 0 : i32
    return %c0_i32, %c0_i32_0, %c0_i32_1 : i32, i32, i32
  }
  func.func @transform_2(%arg0: i32) -> (i32, i32) {
    %c0_i32 = arith.constant 0 : i32
    %c0_i32_0 = arith.constant 0 : i32
    %c0_i32_1 = arith.constant 0 : i32
    return %c0_i32, %c0_i32_0 : i32, i32
  }
  func.func @transform_3(%arg0: i32) -> (i32, i32, i32) {
    %c0_i32 = arith.constant 0 : i32
    %c0_i32_0 = arith.constant 0 : i32
    %c0_i32_1 = arith.constant 0 : i32
    %c0_i32_2 = arith.constant 0 : i32
    return %c0_i32, %c0_i32_0, %c0_i32_1 : i32, i32, i32
  }
  func.func @transform_4(%arg0: i32) -> (i32, i32) {
    %c0_i32 = arith.constant 0 : i32
    %c0_i32_0 = arith.constant 0 : i32
    %c0_i32_1 = arith.constant 0 : i32
    return %c0_i32, %c0_i32_0 : i32, i32
  }
  func.func @transform_5(%arg0: i32) -> (i32, i32) {
    %c0_i32 = arith.constant 0 : i32
    %c0_i32_0 = arith.constant 0 : i32
    %c0_i32_1 = arith.constant 0 : i32
    return %c0_i32, %c0_i32_0 : i32, i32
  }
  func.func @transform_6(%arg0: i32) -> (i32, i32) {
    %c0_i32 = arith.constant 0 : i32
    %c0_i32_0 = arith.constant 0 : i32
    %c0_i32_1 = arith.constant 0 : i32
    return %c0_i32, %c0_i32_0 : i32, i32
  }
  func.func @transform_7(%arg0: i32) -> (i32, i32, i32, i32) {
    %c0_i32 = arith.constant 0 : i32
    %c0_i32_0 = arith.constant 0 : i32
    %c0_i32_1 = arith.constant 0 : i32
    %c0_i32_2 = arith.constant 0 : i32
    return %arg0, %c0_i32, %c0_i32_0, %c0_i32_1 : i32, i32, i32, i32
  }
}

</mosaic_0001>

<bundles_post_ra>
// kernel: tpu_custom_call.1
= control target key start
LH: loop header
LB: loop body
LE: loop exit
PB: predicated region body
PF: predicated region fallthrough
CT: control target
= control target key end

     0   :  { %12 = vsyncpa [#allocation6], 0  ;;  %s3766_s0 = inlined_call_operand.vmem [shape: f32[2,18,8,12], index: 0, kind: input, shape index: {}]   ;;  %s3767_s1 = inlined_call_operand.vmem [shape: f32[3,12,8], index: 1, kind: input, shape index: {}]   ;;  %s3768_s2 = inlined_call_operand.vmem [shape: f32[1,8], index: 2, kind: input, shape index: {}]   ;;  %s3769_s3 = inlined_call_operand.vmem [shape: f32[9,8,8], index: 3, kind: input, shape index: {}]   ;;  %s3770_s4 = inlined_call_operand.vmem [shape: f32[1,8], index: 4, kind: input, shape index: {}]   ;;  %s3771_s5 = inlined_call_operand.vmem [shape: f32[12,8], index: 5, kind: input, shape index: {}]   ;;  %s3772_s6 = inlined_call_operand.vmem [shape: f32[1,8], index: 6, kind: input, shape index: {}]   ;;  %s3773_s7 = inlined_call_operand.hbm [shape: f32[2,8,8,8], index: 7, kind: output, shape index: {}]  }
   0x1   :  { %14 = vsyncpa [#allocation6 + $0x1], 0  ;;  %s3179_s24 = smov 0   ;;  %s3181_s25 = smov 0  }
   0x2   :  { %s3183_s26 = smov 0   ;;  %s3185_s27 = smov 0  }
   0x3 LB: > { %s3200_s28 = sadd.s32 4294967295, %s3133_s27   ;;  %s2556_s29 = sadd.s32 4294967294, %s3133_s27   ;;  %s3133_s27 = sphi %s3185_s27, %s3779_s27   ;;  %s3129_s26 = sphi %s3183_s26, %s3778_s26   ;;  %s3125_s25 = sphi %s3181_s25, %s3777_s25   ;;  %s3121_s24 = sphi %s3179_s24, %s3776_s24  }
   0x4   : > { %s3204_s30 = sadd.s32 1, %s3133_s27   ;;  %s179_s8 = sadd.s32 1, %s3129_s26 }
   0x5   : > { %s176_s9 = ssub.s32 %s3133_s27, %s3204_s30  ;;  %p189_p0 = scmp.ne.s32.totalorder %s3129_s26, %s3125_s25 }
   0x6   : > { %p177_p1 = scmp.eq.s32.totalorder %s176_s9, 0  ;;  %p190_p2 = scmp.eq.s32.totalorder %s3200_s28, 1 }
   0x7   : > { %p195_p3 = scmp.ne.s32.totalorder %s3125_s25, %s3121_s24  ;;  %p196_p4 = scmp.eq.s32.totalorder %s2556_s29, 1 }
   0x8   : > { %s3215_s10 = scalar_select %p177_p1, %s3129_s26, %s179_s8  }
   0x9   : > { %p3217_p5 = por %p190_p2, %p189_p0  ;;  %p3221_p6 = por %p196_p4, %p195_p3 }
   0xa   : > { %p2559_p7 = scmp.ge.s32.totalorder %s3133_s27, 1  ;;  %p240_p8 = scmp.lt.s32.totalorder %s3133_s27, 3 }
   0xc   : > { %p241_p9 = pnand %p2559_p7, %p240_p8 }
   0xd   : > { %p272_p10 = scmp.lt.s32.totalorder (!%p241_p9), %s3200_s28, 1  ;;  %s269_s14 = sand.u32 (!%p241_p9), 1, %s3125_s25  }
   0xe   : > { %244 = sbr.rel (%p241_p9) target bundleno = 578 (0x242), region = 48  ;;  %s2714_s19 = sshll.u32 (!%p241_p9), %s3200_s28, 10 }
   0xf   : > { %s3716_s23 = scalar_lea.hbm (!%p241_p9), %s3773_s7, %s2714_s19 }
  0x13   : > { %v286_v0 = vld [vmem:[%s3767_s1 + $0x8] sm:$0xf]  ;;  %vm312_vm0 = vcmask 1043456   ;;  %v285_v1 = vld [vmem:[%s3767_s1] sm:$0xff]  ;;  %s273_s17 = scalar_select %p272_p10, %s3200_s28, 1  ;;  %vm287_vm1 = vcmask 97280  }
  0x14   : > { %3026 = vmatprep.subr.msk.mxu1 %vm312_vm0, %v286_v0  ;;  %2836 = vmatprep.subr.msk.mxu0 %vm312_vm0, %v286_v0  ;;  %v2580_v2 = vld [vmem:[%s3767_s1 + $0x18] sm:$0xf]  ;;  %v2599_v3 = vld [vmem:[%s3767_s1 + $0x28] sm:$0xf]  ;;  %v2579_v4 = vld [vmem:[%s3767_s1 + $0x10] sm:$0xff]  ;;  %vm421_vm2 = vcmask 64512  }
  0x15   : > { %3028 = vmatpush3.msk.msra.mxu1 %vm312_vm0, %v286_v0  ;;  %2837 = vmatpush3.msk.msra.mxu0 %vm312_vm0, %v286_v0  ;;  %s3030_s22 = smul.u32 144, %s273_s17  ;;  %v2598_v14 = vld [vmem:[%s3767_s1 + $0x20] sm:$0xff]  ;;  %vm772_vm3 = vcmask 57344   ;;  %v3135_v23 = vmov 0.0   ;;  %vm767_vm4 = vcmask 58368   ;;  %v2618_v25 = vld [vmem:[%s3769_s3 + $0x8] sm:$0xff] }
  0x16   : > { %3027 = vmatprep.subr.mxu1 %v285_v1  ;;  %2838 = vmatprep.subr.mxu0 %v285_v1  ;;  %766 = vst.msk [vmem:[#allocation4] sm:$0xff] %vm421_vm2, %v3135_v23  ;;  %770 = vst.msk [vmem:[#allocation4 + $0x90] sm:$0xff] %vm421_vm2, %v3135_v23  ;;  %v841_v24 = vld [vmem:[%s3769_s3] sm:$0xff]  ;;  %v3358_v28 = vld [vmem:[%s3769_s3 + $0x10] sm:$0xff]  ;;  %s2560_s17 = sshll.u32 %s269_s14, 6  ;;  %s3726_s28 = scalar_lea.sflag [#allocation6], %s269_s14 }
  0x17   : > { %3029 = vmatpush3.msra.mxu1 %v285_v1  ;;  %2839 = vmatpush3.msra.mxu0 %v285_v1  ;;  %s3250_s8 = scalar_lea.vmem %s3766_s0, %s3030_s22  ;;  %774 = vst.msk [vmem:[#allocation4 + $0x10] sm:$0x1] %vm772_vm3, %v3135_v23  ;;  %775 = vst.msk [vmem:[#allocation4 + $0x20] sm:$0x1] %vm772_vm3, %v3135_v23  ;;  %v3364_v29 = vld [vmem:[%s3769_s3 + $0x18] sm:$0xff]  ;;  %s3692_s18 = scalar_lea.vmem [#allocation5], %s2560_s17 }
  0x18   : > { %2852 = vmatprep.subr.msk.mxu1 %vm312_vm0, %v2580_v2  ;;  %2868 = vmatprep.subr.msk.mxu0 %vm312_vm0, %v2599_v3  ;;  %v277_v5 = vld [vmem:[%s3250_s8] sm:$0xff]  ;;  %v278_v7 = vld [vmem:[%s3250_s8 + $0x10] sm:$0xff]  ;;  %v3271_v13 = vld [vmem:[%s3250_s8 + $0x8] sm:$0xff]  ;;  %776 = vst.msk [vmem:[#allocation4 + $0x30] sm:$0x1] %vm772_vm3, %v3135_v23  ;;  %s2494_s20 = sshll.u32 %s3692_s18, 4  ;;  %s3718_s20 = int_to_ptr.vmem [resolvable:$true] %s2494_s20 }
  0x19   : > { %v281_v6 = vld [vmem:[%s3250_s8 + $0x40] sm:$0xff]  ;;  %2840 = vmatprep.mubr.msk.f32.mxu0 %vm287_vm1, %v277_v5  ;;  %v282_v8 = vld [vmem:[%s3250_s8 + $0x50] sm:$0xff]  ;;  %v3282_v15 = vld [vmem:[%s3250_s8 + $0x18] sm:$0xff]  ;;  %777 = vst.msk [vmem:[#allocation4 + $0x40] sm:$0x1] %vm772_vm3, %v3135_v23  ;;  %s3073_s29 = scalar_lea.vmem %s3718_s20, 1024 }
  0x1a   : > { %2846 = vmatprep.mubr.msk.f32.mxu1 %vm287_vm1, %v281_v6  ;;  %v279_v9 = vld [vmem:[%s3250_s8 + $0x20] sm:$0xff]  ;;  %2841 = vmatmul.mubr.msk.f32.vlgmr.msra.gmra.mxu0 %vm287_vm1, %v278_v7  ;;  %v280_v11 = vld [vmem:[%s3250_s8 + $0x30] sm:$0xff]  ;;  %v3285_v16 = vld [vmem:[%s3250_s8 + $0x28] sm:$0xff]  ;;  %778 = vst.msk [vmem:[#allocation4 + $0x50] sm:$0x1] %vm772_vm3, %v3135_v23  ;;  %p3074_p11 = scmp.ne.s32.totalorder %s3718_s20, %s3073_s29 }
  0x1b   : > { %v283_v10 = vld [vmem:[%s3250_s8 + $0x60] sm:$0xff]  ;;  %2847 = vmatmul.mubr.msk.f32.vlgmr.msra.gmra.mxu1 %vm287_vm1, %v282_v8  ;;  %2843 = vmatprep.mubr.msk.f32.mxu0 %vm287_vm1, %v279_v9  ;;  %v284_v12 = vld [vmem:[%s3250_s8 + $0x70] sm:$0xff]  ;;  %v3294_v17 = vld [vmem:[%s3250_s8 + $0x38] sm:$0xff]  ;;  %779 = vst.msk [vmem:[#allocation4 + $0x60] sm:$0x1] %vm772_vm3, %v3135_v23 }
  0x1c   : > { %2853 = vmatpush3.msk.msra.mxu1 %vm312_vm0, %v2580_v2  ;;  %2849 = vmatprep.mubr.msk.f32.mxu1 %vm287_vm1, %v283_v10  ;;  %v3298_v18 = vld [vmem:[%s3250_s8 + $0x48] sm:$0xff]  ;;  %v3306_v19 = vld [vmem:[%s3250_s8 + $0x58] sm:$0xff]  ;;  %v2597_v22 = vld [vmem:[%s3250_s8 + $0x80] sm:$0xff]  ;;  %780 = vst.msk [vmem:[#allocation4 + $0x70] sm:$0x1] %vm772_vm3, %v3135_v23  ;;  %p3075_p12 = pnand %p3074_p11, %p3217_p5 }
  0x1d   : > { %2854 = vmatprep.subr.mxu1 %v2579_v4  ;;  %2869 = vmatpush3.msk.msra.mxu0 %vm312_vm0, %v2599_v3  ;;  %v3310_v20 = vld [vmem:[%s3250_s8 + $0x68] sm:$0xff]  ;;  %v3318_v21 = vld [vmem:[%s3250_s8 + $0x78] sm:$0xff]  ;;  %781 = vst.msk [vmem:[#allocation4 + $0x80] sm:$0x1] %vm772_vm3, %v3135_v23  ;;  %784 = vst.msk [vmem:[#allocation4 + $0x19] sm:$0x1] %vm772_vm3, %v3135_v23 }
  0x1e   : > { %2855 = vmatpush3.msra.mxu1 %v2579_v4  ;;  %2844 = vmatmul.mubr.msk.f32.gmra.mxu0 %vm287_vm1, %v280_v11  ;;  %785 = vst.msk [vmem:[#allocation4 + $0x29] sm:$0x1] %vm772_vm3, %v3135_v23  ;;  %786 = vst.msk [vmem:[#allocation4 + $0x39] sm:$0x1] %vm772_vm3, %v3135_v23  ;;  %p3076_p13 = pneg %p3075_p12  ;;  %s3136_s8 = smov [#allocation5]  }
  0x1f   : > { %2850 = vmatmul.mubr.msk.f32.gmra.mxu1 %vm287_vm1, %v284_v12  ;;  %2870 = vmatprep.subr.mxu0 %v2598_v14  ;;  %787 = vst.msk [vmem:[#allocation4 + $0x49] sm:$0x1] %vm772_vm3, %v3135_v23  ;;  %788 = vst.msk [vmem:[#allocation4 + $0x59] sm:$0x1] %vm772_vm3, %v3135_v23  ;;  %s3077_s9 = sshll.u32 %s3136_s8, 4  ;;  %s3078_s9 = int_to_ptr.vmem [resolvable:$false] %s3077_s9 }
  0x20   : > { %2856 = vmatprep.mubr.msk.f32.mxu1 %vm287_vm1, %v3271_v13  ;;  %2871 = vmatpush3.msra.mxu0 %v2598_v14  ;;  %789 = vst.msk [vmem:[#allocation4 + $0x69] sm:$0x1] %vm772_vm3, %v3135_v23  ;;  %790 = vst.msk [vmem:[#allocation4 + $0x79] sm:$0x1] %vm772_vm3, %v3135_v23  ;;  %s3079_s13 = scalar_lea.vmem %s3078_s9, 2048  ;;  %p3080_p0 = scmp.lt.s32.totalorder %s3718_s20, %s3078_s9 }
  0x21   : > { %2872 = vmatprep.mubr.msk.f32.mxu0 %vm287_vm1, %v278_v7  ;;  %791 = vst.msk [vmem:[#allocation4 + $0x89] sm:$0x1] %vm772_vm3, %v3135_v23  ;;  %773 = vst.msk [vmem:[#allocation4] sm:$0x1] %vm772_vm3, %v3135_v23  ;;  %2884 = vmatprep.subr.mxu1 %v841_v24  ;;  %p3081_p1 = scmp.lt.s32.totalorder %s3079_s13, %s3073_s29 }
  0x22   : > { %2873 = vmatmul.mubr.msk.f32.vlgmr.msra.gmra.mxu0 %vm287_vm1, %v279_v9  ;;  %768 = vst.msk [vmem:[#allocation4 + $0x8] sm:$0x3] %vm767_vm4, %v3135_v23  ;;  %771 = vst.msk [vmem:[#allocation4 + $0x98] sm:$0x3] %vm767_vm4, %v3135_v23  ;;  %2898 = vmatprep.subr.mxu0 %v2618_v25 }
  0x23   : > { %2857 = vmatmul.mubr.msk.f32.vlgmr.msra.gmra.mxu1 %vm287_vm1, %v3282_v15  ;;  %2875 = vmatprep.mubr.msk.f32.mxu0 %vm287_vm1, %v280_v11  ;;  %782 = vst.msk [vmem:[#allocation4 + $0x90] sm:$0x1] %vm772_vm3, %v3135_v23  ;;  %783 = vst.msk [vmem:[#allocation4 + $0x9] sm:$0x1] %vm772_vm3, %v3135_v23  ;;  %p3082_p2 = por %p3081_p1, %p3080_p0 }
  0x24   : > { %2859 = vmatprep.mubr.msk.f32.mxu1 %vm287_vm1, %v3285_v16  ;;  %792 = vst.msk [vmem:[#allocation4 + $0x99] sm:$0x1] %vm772_vm3, %v3135_v23  ;;  %2885 = vmatpush3.msra.mxu1 %v841_v24 }
  0x25   : > { %2899 = vmatpush3.msra.mxu0 %v2618_v25  ;;  %2912 = vmatprep.subr.mxu1 %v3358_v28  ;;  %p3083_p3 = pnand %p3082_p2, %p3076_p13 }
  0x26   : > { %2876 = vmatmul.mubr.msk.f32.gmra.mxu0 %vm287_vm1, %v281_v6  ;;  %2926 = vmatprep.subr.mxu0 %v3364_v29 }
  0x27   : > { %2860 = vmatmul.mubr.msk.f32.gmra.mxu1 %vm287_vm1, %v3294_v17  ;;  %2878 = vmatprep.mubr.msk.f32.mxu0 %vm287_vm1, %v282_v8 }
  0x28   : > { %2862 = vmatprep.mubr.msk.f32.mxu1 %vm287_vm1, %v3298_v18  ;;  %v833_v26 = vld [vmem:[#allocation4] sm:$0xff] }
  0x29   : > { %v979_v27 = vld [vmem:[#allocation4 + $0x1] sm:$0xff] }
  0x2a   : > { %2879 = vmatmul.mubr.msk.f32.gmra.mxu0 %vm287_vm1, %v283_v10 }
  0x2b   : > { %2863 = vmatmul.mubr.msk.f32.gmra.mxu1 %vm287_vm1, %v3306_v19  ;;  %2881 = vmatprep.mubr.msk.f32.mxu0 %vm287_vm1, %v284_v12  ;;  %v2609_v12 = vld [vmem:[%s3768_s2] ss:$0 sm:$0xff] }
  0x2c   : > { %2865 = vmatprep.mubr.msk.f32.mxu1 %vm287_vm1, %v3310_v20 }
  0x2e   : > { %2882 = vmatmul.mubr.msk.f32.gmra.mxu0 %vm287_vm1, %v2597_v22 }
  0x2f   : > { %2866 = vmatmul.mubr.msk.f32.gmra.mxu1 %vm287_vm1, %v3318_v21  ;;  %2900 = vmatprep.mubr.msk.f32.mxu0 %vm421_vm2, %v979_v27 }
  0x30   : > { %2886 = vmatprep.mubr.msk.f32.mxu1 %vm421_vm2, %v833_v26 }
  0xda   : > { %v2842_v30 = vpop.f32.mrf.mxu0 }
  0xdb   : > { %v2848_v31 = vpop.f32.mrf.mxu1  ;;  %423 = vst.msk [vmem:[#allocation2 + $0x8] sm:$0xff] %vm421_vm2, %v2842_v30 }
  0xdc   : > { %427 = vst.msk [vmem:[#allocation2 + $0x28] sm:$0xff] %vm421_vm2, %v2848_v31  ;;  %v382_v32 = vpop.f32.mrf.mxu0 }
  0xdd   : > { %v402_v33 = vpop.f32.mrf.mxu1  ;;  %422 = vst.msk [vmem:[#allocation2] sm:$0xff] %vm421_vm2, %v382_v32 }
  0xde   : > { %426 = vst.msk [vmem:[#allocation2 + $0x20] sm:$0xff] %vm421_vm2, %v402_v33  ;;  %v2845_v34 = vpop.f32.mrf.mxu0 }
  0xdf   : > { %v2851_v35 = vpop.f32.mrf.mxu1  ;;  %425 = vst.msk [vmem:[#allocation2 + $0x18] sm:$0xff] %vm421_vm2, %v2845_v34 }
  0xe0   : > { %429 = vst.msk [vmem:[#allocation2 + $0x38] sm:$0xff] %vm421_vm2, %v2851_v35  ;;  %v392_v36 = vpop.f32.mrf.mxu0 }
  0xe1   : > { %v412_v37 = vpop.f32.mrf.mxu1  ;;  %424 = vst.msk [vmem:[#allocation2 + $0x10] sm:$0xff] %vm421_vm2, %v392_v36 }
  0xe2   : > { %428 = vst.msk [vmem:[#allocation2 + $0x30] sm:$0xff] %vm421_vm2, %v412_v37  ;;  %v575_v39 = vld [vmem:[#allocation2 + $0x8] sm:$0xff]  ;;  %v2874_v40 = vpop.f32.mrf.mxu0 }
  0xe3   : > { %v2858_v38 = vpop.f32.mrf.mxu1  ;;  %v579_v54 = vld [vmem:[#allocation2 + $0x28] sm:$0xff] }
  0xe4   : > { %v583_v41 = vadd.f32 %v2858_v38, %v575_v39  ;;  %v574_v43 = vld [vmem:[#allocation2] sm:$0xff]  ;;  %v703_v44 = vpop.f32.mrf.mxu0 }
  0xe5   : > { %v535_v42 = vpop.f32.mrf.mxu1  ;;  %v578_v59 = vld [vmem:[#allocation2 + $0x20] sm:$0xff] }
  0xe6   : > { %591 = vst.msk [vmem:[#allocation2 + $0x8] sm:$0xff] %vm421_vm2, %v583_v41  ;;  %v582_v45 = vadd.f32 %v574_v43, %v535_v42  ;;  %v577_v47 = vld [vmem:[#allocation2 + $0x18] sm:$0xff]  ;;  %v2877_v48 = vpop.f32.mrf.mxu0 }
  0xe7   : > { %v2861_v46 = vpop.f32.mrf.mxu1  ;;  %v581_v0 = vld [vmem:[#allocation2 + $0x38] sm:$0xff] }
  0xe8   : > { %590 = vst.msk [vmem:[#allocation2] sm:$0xff] %vm421_vm2, %v582_v45  ;;  %v585_v49 = vadd.f32 %v2861_v46, %v577_v47  ;;  %v576_v51 = vld [vmem:[#allocation2 + $0x10] sm:$0xff]  ;;  %v713_v55 = vpop.f32.mrf.mxu0 }
  0xe9   : > { %v545_v50 = vpop.f32.mrf.mxu1  ;;  %v580_v6 = vld [vmem:[#allocation2 + $0x30] sm:$0xff] }
  0xea   : > { %593 = vst.msk [vmem:[#allocation2 + $0x18] sm:$0xff] %vm421_vm2, %v585_v49  ;;  %v584_v52 = vadd.f32 %v576_v51, %v545_v50  ;;  %v2880_v1 = vpop.f32.mrf.mxu0 }
  0xeb   : > { %v2864_v53 = vpop.f32.mrf.mxu1 }
  0xec   : > { %592 = vst.msk [vmem:[#allocation2 + $0x10] sm:$0xff] %vm421_vm2, %v584_v52  ;;  %v587_v56 = vadd.f32 %v2864_v53, %v579_v54  ;;  %v723_v10 = vpop.f32.mrf.mxu0  ;;  %v2645_v52 = vld [vmem:[%s3769_s3 + $0x20] sm:$0xff] }
  0xed   : > { %v743_v57 = vld [vmem:[#allocation2 + $0x8] sm:$0xff]  ;;  %v555_v58 = vpop.f32.mrf.mxu1 }
  0xee   : > { %595 = vst.msk [vmem:[#allocation2 + $0x28] sm:$0xff] %vm421_vm2, %v587_v56  ;;  %v751_v60 = vadd.f32 %v2874_v40, %v743_v57  ;;  %v586_v61 = vadd.f32 %v578_v59, %v555_v58  ;;  %v2883_v25 = vpop.f32.mrf.mxu0 }
  0xef   : > { %v742_v62 = vld [vmem:[#allocation2] sm:$0xff]  ;;  %v2867_v63 = vpop.f32.mrf.mxu1 }
  0xf0   : > { %759 = vst.msk [vmem:[#allocation2 + $0x8] sm:$0xff] %vm421_vm2, %v751_v60  ;;  %594 = vst.msk [vmem:[#allocation2 + $0x20] sm:$0xff] %vm421_vm2, %v586_v61  ;;  %v750_v2 = vadd.f32 %v742_v62, %v703_v44  ;;  %v589_v3 = vadd.f32 %v2867_v63, %v581_v0  ;;  %v733_v36 = vpop.f32.mrf.mxu0  ;;  %v2654_v61 = vld [vmem:[%s3769_s3 + $0x28] sm:$0xff] }
  0xf1   : > { %v745_v4 = vld [vmem:[#allocation2 + $0x18] sm:$0xff]  ;;  %v565_v5 = vpop.f32.mrf.mxu1 }
  0xf2   : > { %758 = vst.msk [vmem:[#allocation2] sm:$0xff] %vm421_vm2, %v750_v2  ;;  %597 = vst.msk [vmem:[#allocation2 + $0x38] sm:$0xff] %vm421_vm2, %v589_v3  ;;  %v753_v7 = vadd.f32 %v2877_v48, %v745_v4  ;;  %v588_v8 = vadd.f32 %v580_v6, %v565_v5  ;;  %v1142_v5 = vld [vmem:[#allocation4 + $0x2] sm:$0xff] }
  0xf3   : > { %v744_v9 = vld [vmem:[#allocation2 + $0x10] sm:$0xff] }
  0xf4   : > { %761 = vst.msk [vmem:[#allocation2 + $0x18] sm:$0xff] %vm421_vm2, %v753_v7  ;;  %596 = vst.msk [vmem:[#allocation2 + $0x30] sm:$0xff] %vm421_vm2, %v588_v8  ;;  %v752_v11 = vadd.f32 %v744_v9, %v713_v55 }
  0xf5   : > { %v747_v14 = vld [vmem:[#allocation2 + $0x28] sm:$0xff] }
  0xf6   : > { %760 = vst.msk [vmem:[#allocation2 + $0x10] sm:$0xff] %vm421_vm2, %v752_v11  ;;  %v755_v22 = vadd.f32 %v2880_v1, %v747_v14  ;;  %v2672_v11 = vld [vmem:[%s3769_s3 + $0x38] sm:$0xff] }
  0xf7   : > { %v794_v23 = vld [vmem:[#allocation2 + $0x8] sm:$0xff]  ;;  %v746_v24 = vld [vmem:[#allocation2 + $0x20] sm:$0xff] }
  0xf8   : > { %763 = vst.msk [vmem:[#allocation2 + $0x28] sm:$0xff] %vm421_vm2, %v755_v22  ;;  %v754_v26 = vadd.f32 %v746_v24, %v723_v10  ;;  %v809_v27 = vadd.f32 %v2609_v12, %v794_v23  ;;  %v2663_v10 = vld [vmem:[%s3769_s3 + $0x30] sm:$0xff] }
  0xf9   : > { %v793_v30 = vld [vmem:[#allocation2] sm:$0xff]  ;;  %v749_v31 = vld [vmem:[#allocation2 + $0x38] sm:$0xff] }
  0xfa   : > { %v808_v32 = vadd.f32 %v2609_v12, %v793_v30  ;;  %762 = vst.msk [vmem:[#allocation2 + $0x20] sm:$0xff] %vm421_vm2, %v754_v26  ;;  %v757_v33 = vadd.f32 %v2883_v25, %v749_v31  ;;  %v817_v34 = vmax.f32 %v809_v27, 0.0  ;;  %v2681_v26 = vld [vmem:[%s3769_s3 + $0x40] sm:$0xff]  ;;  %v2293_v27 = vld [vmem:[%s3771_s5 + $0x8] sm:$0xf] }
  0xfb   : > { %v796_v35 = vld [vmem:[#allocation2 + $0x18] sm:$0xff]  ;;  %v748_v37 = vld [vmem:[#allocation2 + $0x30] sm:$0xff] }
  0xfc   : > { %v816_v38 = vmax.f32 %v808_v32, 0.0  ;;  %765 = vst.msk [vmem:[#allocation2 + $0x38] sm:$0xff] %vm421_vm2, %v757_v33  ;;  %v756_v39 = vadd.f32 %v748_v37, %v733_v36  ;;  %826 = vst.msk [vmem:[#allocation4 + $0x21] sm:$0xff] %vm421_vm2, %v817_v34  ;;  %v811_v40 = vadd.f32 %v2609_v12, %v796_v35  ;;  %v2292_v32 = vld [vmem:[%s3771_s5] sm:$0xff]  ;;  %v1802_v33 = vld [vmem:[#allocation4 + $0x90] sm:$0xff] }
  0xfd   : > { %v795_v41 = vld [vmem:[#allocation2 + $0x10] sm:$0xff] }
  0xfe   : > { %825 = vst.msk [vmem:[#allocation4 + $0x11] sm:$0xff] %vm421_vm2, %v816_v38  ;;  %764 = vst.msk [vmem:[#allocation2 + $0x30] sm:$0xff] %vm421_vm2, %v756_v39  ;;  %v810_v42 = vadd.f32 %v2609_v12, %v795_v41  ;;  %v819_v43 = vmax.f32 %v811_v40, 0.0  ;;  %v1965_v34 = vld [vmem:[#allocation4 + $0x91] sm:$0xff] }
  0xff   : > { %v798_v44 = vld [vmem:[#allocation2 + $0x28] sm:$0xff] }
 0x100   : > { %v818_v45 = vmax.f32 %v810_v42, 0.0  ;;  %828 = vst.msk [vmem:[#allocation4 + $0x41] sm:$0xff] %vm421_vm2, %v819_v43  ;;  %v813_v46 = vadd.f32 %v2609_v12, %v798_v44 }
 0x101   : > { %v797_v47 = vld [vmem:[#allocation2 + $0x20] sm:$0xff] }
 0x102   : > { %827 = vst.msk [vmem:[#allocation4 + $0x31] sm:$0xff] %vm421_vm2, %v818_v45  ;;  %v812_v48 = vadd.f32 %v2609_v12, %v797_v47  ;;  %v821_v49 = vmax.f32 %v813_v46, 0.0 }
 0x103   : > { %v800_v50 = vld [vmem:[#allocation2 + $0x38] sm:$0xff]  ;;  %v3407_v57 = vld [vmem:[#allocation4 + $0x20] sm:$0xff] }
 0x104   : > { %v820_v51 = vmax.f32 %v812_v48, 0.0  ;;  %830 = vst.msk [vmem:[#allocation4 + $0x61] sm:$0xff] %vm421_vm2, %v821_v49  ;;  %v815_v53 = vadd.f32 %v2609_v12, %v800_v50  ;;  %v3409_v58 = vld [vmem:[#allocation4 + $0x21] sm:$0xff] }
 0x105   : > { %v799_v54 = vld [vmem:[#allocation2 + $0x30] sm:$0xff]  ;;  %v3468_v9 = vld [vmem:[#allocation4 + $0x22] sm:$0xff] }
 0x106   : > { %v834_v55 = vld [vmem:[#allocation4 + $0x10] sm:$0xff]  ;;  %829 = vst.msk [vmem:[#allocation4 + $0x51] sm:$0xff] %vm421_vm2, %v820_v51  ;;  %v814_v59 = vadd.f32 %v2609_v12, %v799_v54  ;;  %v823_v60 = vmax.f32 %v815_v53, 0.0 }
 0x107   : > { %v3402_v56 = vld [vmem:[#allocation4 + $0x11] sm:$0xff]  ;;  %2887 = vmatmul.mubr.msk.f32.vlgmr.msra.gmra.mxu1 %vm421_vm2, %v834_v55  ;;  %v3430_v1 = vld [vmem:[#allocation4 + $0x40] sm:$0xff] }
 0x108   : > { %2901 = vmatmul.mubr.msk.f32.vlgmr.msra.gmra.mxu0 %vm421_vm2, %v3402_v56  ;;  %2889 = vmatprep.mubr.msk.f32.mxu1 %vm421_vm2, %v3407_v57  ;;  %v822_v62 = vmax.f32 %v814_v59, 0.0  ;;  %832 = vst.msk [vmem:[#allocation4 + $0x81] sm:$0xff] %vm421_vm2, %v823_v60  ;;  %v1143_v8 = vld [vmem:[#allocation4 + $0x12] sm:$0xff]  ;;  %v3486_v14 = vld [vmem:[#allocation4 + $0x42] sm:$0xff] }
 0x109   : > { %2903 = vmatprep.mubr.msk.f32.mxu0 %vm421_vm2, %v3409_v58  ;;  %2913 = vmatpush3.msra.mxu1 %v3358_v28  ;;  %v3422_v63 = vld [vmem:[#allocation4 + $0x30] sm:$0xff]  ;;  %v3432_v28 = vld [vmem:[#allocation4 + $0x41] sm:$0xff] }
 0x10a   : > { %2927 = vmatpush3.msra.mxu0 %v3364_v29  ;;  %v3424_v0 = vld [vmem:[#allocation4 + $0x31] sm:$0xff]  ;;  %2940 = vmatprep.subr.mxu1 %v2645_v52  ;;  %831 = vst.msk [vmem:[#allocation4 + $0x71] sm:$0xff] %vm421_vm2, %v822_v62 }
 0x10b   : > { %2954 = vmatprep.subr.mxu0 %v2654_v61  ;;  %2890 = vmatmul.mubr.msk.f32.gmra.mxu1 %vm421_vm2, %v3422_v63  ;;  %v3447_v3 = vld [vmem:[#allocation4 + $0x60] sm:$0xff]  ;;  %v3480_v12 = vld [vmem:[#allocation4 + $0x32] sm:$0xff] }
 0x10c   : > { %2904 = vmatmul.mubr.msk.f32.gmra.mxu0 %vm421_vm2, %v3424_v0  ;;  %2892 = vmatprep.mubr.msk.f32.mxu1 %vm421_vm2, %v3430_v1  ;;  %v3449_v4 = vld [vmem:[#allocation4 + $0x61] sm:$0xff] }
 0x10d   : > { %2906 = vmatprep.mubr.msk.f32.mxu0 %vm421_vm2, %v3432_v28  ;;  %v3439_v29 = vld [vmem:[#allocation4 + $0x50] sm:$0xff]  ;;  %v1148_v23 = vld [vmem:[#allocation4 + $0x62] sm:$0xff] }
 0x10e   : > { %v3441_v2 = vld [vmem:[#allocation4 + $0x51] sm:$0xff] }
 0x10f   : > { %2893 = vmatmul.mubr.msk.f32.gmra.mxu1 %vm421_vm2, %v3439_v29  ;;  %v3492_v22 = vld [vmem:[#allocation4 + $0x52] sm:$0xff]  ;;  %v1312_v25 = vld [vmem:[#allocation4 + $0x80] sm:$0xff] }
 0x110   : > { %2907 = vmatmul.mubr.msk.f32.gmra.mxu0 %vm421_vm2, %v3441_v2  ;;  %2895 = vmatprep.mubr.msk.f32.mxu1 %vm421_vm2, %v3447_v3  ;;  %v1475_v30 = vld [vmem:[#allocation4 + $0x81] sm:$0xff] }
 0x111   : > { %2909 = vmatprep.mubr.msk.f32.mxu0 %vm421_vm2, %v3449_v4  ;;  %v3455_v6 = vld [vmem:[#allocation4 + $0x70] sm:$0xff]  ;;  %v1638_v31 = vld [vmem:[#allocation4 + $0x82] sm:$0xff] }
 0x112   : > { %v3457_v7 = vld [vmem:[#allocation4 + $0x71] sm:$0xff] }
 0x113   : > { %2896 = vmatmul.mubr.msk.f32.gmra.mxu1 %vm421_vm2, %v3455_v6  ;;  %v1149_v24 = vld [vmem:[#allocation4 + $0x72] sm:$0xff] }
 0x114   : > { %2910 = vmatmul.mubr.msk.f32.gmra.mxu0 %vm421_vm2, %v3457_v7  ;;  %2914 = vmatprep.mubr.msk.f32.mxu1 %vm421_vm2, %v1142_v5 }
 0x115   : > { %2928 = vmatprep.mubr.msk.f32.mxu0 %vm421_vm2, %v834_v55 }
 0x117   : > { %2915 = vmatmul.mubr.msk.f32.vlgmr.msra.gmra.mxu1 %vm421_vm2, %v1143_v8 }
 0x118   : > { %2929 = vmatmul.mubr.msk.f32.vlgmr.msra.gmra.mxu0 %vm421_vm2, %v3407_v57  ;;  %2917 = vmatprep.mubr.msk.f32.mxu1 %vm421_vm2, %v3468_v9 }
 0x119   : > { %2931 = vmatprep.mubr.msk.f32.mxu0 %vm421_vm2, %v3422_v63  ;;  %2941 = vmatpush3.msra.mxu1 %v2645_v52 }
 0x11a   : > { %2955 = vmatpush3.msra.mxu0 %v2654_v61  ;;  %2968 = vmatprep.subr.mxu1 %v2663_v10 }
 0x11b   : > { %2982 = vmatprep.subr.mxu0 %v2672_v11  ;;  %2918 = vmatmul.mubr.msk.f32.gmra.mxu1 %vm421_vm2, %v3480_v12 }
 0x11c   : > { %2932 = vmatmul.mubr.msk.f32.gmra.mxu0 %vm421_vm2, %v3430_v1  ;;  %2920 = vmatprep.mubr.msk.f32.mxu1 %vm421_vm2, %v3486_v14 }
 0x11d   : > { %2934 = vmatprep.mubr.msk.f32.mxu0 %vm421_vm2, %v3439_v29 }
 0x11f   : > { %2921 = vmatmul.mubr.msk.f32.gmra.mxu1 %vm421_vm2, %v3492_v22 }
 0x120   : > { %2935 = vmatmul.mubr.msk.f32.gmra.mxu0 %vm421_vm2, %v3447_v3  ;;  %2923 = vmatprep.mubr.msk.f32.mxu1 %vm421_vm2, %v1148_v23 }
 0x121   : > { %2937 = vmatprep.mubr.msk.f32.mxu0 %vm421_vm2, %v3455_v6 }
 0x123   : > { %2924 = vmatmul.mubr.msk.f32.gmra.mxu1 %vm421_vm2, %v1149_v24 }
 0x124   : > { %2938 = vmatmul.mubr.msk.f32.gmra.mxu0 %vm421_vm2, %v1312_v25  ;;  %2942 = vmatprep.mubr.msk.f32.mxu1 %vm421_vm2, %v3402_v56 }
 0x125   : > { %2956 = vmatprep.mubr.msk.f32.mxu0 %vm421_vm2, %v1143_v8 }
 0x127   : > { %2943 = vmatmul.mubr.msk.f32.vlgmr.msra.gmra.mxu1 %vm421_vm2, %v3409_v58 }
 0x128   : > { %2957 = vmatmul.mubr.msk.f32.vlgmr.msra.gmra.mxu0 %vm421_vm2, %v3468_v9  ;;  %2945 = vmatprep.mubr.msk.f32.mxu1 %vm421_vm2, %v3424_v0 }
 0x129   : > { %2959 = vmatprep.mubr.msk.f32.mxu0 %vm421_vm2, %v3480_v12  ;;  %2969 = vmatpush3.msra.mxu1 %v2663_v10 }
 0x12a   : > { %2983 = vmatpush3.msra.mxu0 %v2672_v11  ;;  %2996 = vmatprep.subr.mxu1 %v2681_v26 }
 0x12b   : > { %3010 = vmatprep.subr.msk.mxu0 %vm312_vm0, %v2293_v27  ;;  %2946 = vmatmul.mubr.msk.f32.gmra.mxu1 %vm421_vm2, %v3432_v28 }
 0x12c   : > { %2960 = vmatmul.mubr.msk.f32.gmra.mxu0 %vm421_vm2, %v3486_v14  ;;  %2948 = vmatprep.mubr.msk.f32.mxu1 %vm421_vm2, %v3441_v2 }
 0x12d   : > { %2962 = vmatprep.mubr.msk.f32.mxu0 %vm421_vm2, %v3492_v22 }
 0x12f   : > { %2949 = vmatmul.mubr.msk.f32.gmra.mxu1 %vm421_vm2, %v3449_v4 }
 0x130   : > { %2963 = vmatmul.mubr.msk.f32.gmra.mxu0 %vm421_vm2, %v1148_v23  ;;  %2951 = vmatprep.mubr.msk.f32.mxu1 %vm421_vm2, %v3457_v7 }
 0x131   : > { %2965 = vmatprep.mubr.msk.f32.mxu0 %vm421_vm2, %v1149_v24 }
 0x133   : > { %2952 = vmatmul.mubr.msk.f32.gmra.mxu1 %vm421_vm2, %v1475_v30 }
 0x134   : > { %2966 = vmatmul.mubr.msk.f32.gmra.mxu0 %vm421_vm2, %v1638_v31  ;;  %2970 = vmatprep.mubr.msk.f32.mxu1 %vm421_vm2, %v3407_v57 }
 0x135   : > { %2984 = vmatprep.mubr.msk.f32.mxu0 %vm421_vm2, %v3409_v58 }
 0x137   : > { %2971 = vmatmul.mubr.msk.f32.vlgmr.msra.gmra.mxu1 %vm421_vm2, %v3422_v63 }
 0x138   : > { %2985 = vmatmul.mubr.msk.f32.vlgmr.msra.gmra.mxu0 %vm421_vm2, %v3424_v0  ;;  %2973 = vmatprep.mubr.msk.f32.mxu1 %vm421_vm2, %v3430_v1 }
 0x139   : > { %2987 = vmatprep.mubr.msk.f32.mxu0 %vm421_vm2, %v3432_v28  ;;  %2997 = vmatpush3.msra.mxu1 %v2681_v26 }
 0x13a   : > { %3011 = vmatpush3.msk.msra.mxu0 %vm312_vm0, %v2293_v27 }
 0x13b   : > { %3012 = vmatprep.subr.mxu0 %v2292_v32  ;;  %2974 = vmatmul.mubr.msk.f32.gmra.mxu1 %vm421_vm2, %v3439_v29 }
 0x13c   : > { %2988 = vmatmul.mubr.msk.f32.gmra.mxu0 %vm421_vm2, %v3441_v2  ;;  %2976 = vmatprep.mubr.msk.f32.mxu1 %vm421_vm2, %v3447_v3 }
 0x13d   : > { %2990 = vmatprep.mubr.msk.f32.mxu0 %vm421_vm2, %v3449_v4  ;;  %3013 = vmatpush3.msra.mxu0 %v2292_v32 }
 0x13f   : > { %2977 = vmatmul.mubr.msk.f32.gmra.mxu1 %vm421_vm2, %v3455_v6 }
 0x140   : > { %2991 = vmatmul.mubr.msk.f32.gmra.mxu0 %vm421_vm2, %v3457_v7  ;;  %2979 = vmatprep.mubr.msk.f32.mxu1 %vm421_vm2, %v1312_v25 }
 0x141   : > { %2993 = vmatprep.mubr.msk.f32.mxu0 %vm421_vm2, %v1475_v30 }
 0x143   : > { %2980 = vmatmul.mubr.msk.f32.gmra.mxu1 %vm421_vm2, %v1802_v33 }
 0x144   : > { %2994 = vmatmul.mubr.msk.f32.gmra.mxu0 %vm421_vm2, %v1965_v34  ;;  %2998 = vmatprep.mubr.msk.f32.mxu1 %vm421_vm2, %v3468_v9 }
 0x145   : > { %3014 = vmatprep.mubr.msk.f32.mxu0 %vm287_vm1, %v3271_v13  ;;  %v2128_v13 = vld [vmem:[#allocation4 + $0x92] sm:$0xff] }
 0x147   : > { %2999 = vmatmul.mubr.msk.f32.vlgmr.msra.gmra.mxu1 %vm421_vm2, %v3480_v12 }
 0x148   : > { %3015 = vmatmul.mubr.msk.f32.vlgmr.msra.gmra.mxu0 %vm287_vm1, %v3282_v15  ;;  %3001 = vmatprep.mubr.msk.f32.mxu1 %vm421_vm2, %v3486_v14 }
 0x149   : > { %3017 = vmatprep.mubr.msk.f32.mxu0 %vm287_vm1, %v3285_v16 }
 0x14b   : > { %3002 = vmatmul.mubr.msk.f32.gmra.mxu1 %vm421_vm2, %v3492_v22 }
 0x14c   : > { %3018 = vmatmul.mubr.msk.f32.gmra.mxu0 %vm287_vm1, %v3294_v17  ;;  %3004 = vmatprep.mubr.msk.f32.mxu1 %vm421_vm2, %v1148_v23 }
 0x14d   : > { %3020 = vmatprep.mubr.msk.f32.mxu0 %vm287_vm1, %v3298_v18 }
 0x14f   : > { %3005 = vmatmul.mubr.msk.f32.gmra.mxu1 %vm421_vm2, %v1149_v24 }
 0x150   : > { %3021 = vmatmul.mubr.msk.f32.gmra.mxu0 %vm287_vm1, %v3306_v19  ;;  %3007 = vmatprep.mubr.msk.f32.mxu1 %vm421_vm2, %v1638_v31 }
 0x151   : > { %3023 = vmatprep.mubr.msk.f32.mxu0 %vm287_vm1, %v3310_v20 }
 0x153   : > { %3008 = vmatmul.mubr.msk.f32.gmra.mxu1 %vm421_vm2, %v2128_v13 }
 0x154   : > { %3024 = vmatmul.mubr.msk.f32.gmra.mxu0 %vm287_vm1, %v3318_v21 }
 0x1c7   : > { %v2888_v15 = vpop.f32.mrf.mxu1 }
 0x1c8   : > { %v2902_v16 = vpop.f32.mrf.mxu0  ;;  %972 = vst.msk [vmem:[#allocation3 + $0x8] sm:$0xff] %vm421_vm2, %v2888_v15 }
 0x1c9   : > { %v932_v17 = vpop.f32.mrf.mxu1 }
 0x1ca   : > { %v1079_v18 = vpop.f32.mrf.mxu0  ;;  %971 = vst.msk [vmem:[#allocation3] sm:$0xff] %vm421_vm2, %v932_v17 }
 0x1cb   : > { %v2891_v19 = vpop.f32.mrf.mxu1 }
 0x1cc   : > { %v2905_v35 = vpop.f32.mrf.mxu0  ;;  %974 = vst.msk [vmem:[#allocation3 + $0x18] sm:$0xff] %vm421_vm2, %v2891_v19 }
 0x1cd   : > { %v942_v36 = vpop.f32.mrf.mxu1 }
 0x1ce   : > { %v1089_v37 = vpop.f32.mrf.mxu0  ;;  %973 = vst.msk [vmem:[#allocation3 + $0x10] sm:$0xff] %vm421_vm2, %v942_v36 }
 0x1cf   : > { %v1119_v20 = vld [vmem:[#allocation3 + $0x8] sm:$0xff]  ;;  %v2894_v38 = vpop.f32.mrf.mxu1 }
 0x1d0   : > { %v2908_v39 = vpop.f32.mrf.mxu0  ;;  %v1127_v21 = vadd.f32 %v2902_v16, %v1119_v20  ;;  %976 = vst.msk [vmem:[#allocation3 + $0x28] sm:$0xff] %vm421_vm2, %v2894_v38 }
 0x1d1   : > { %v1118_v40 = vld [vmem:[#allocation3] sm:$0xff]  ;;  %v952_v41 = vpop.f32.mrf.mxu1 }
 0x1d2   : > { %v1099_v42 = vpop.f32.mrf.mxu0  ;;  %1135 = vst.msk [vmem:[#allocation3 + $0x8] sm:$0xff] %vm421_vm2, %v1127_v21  ;;  %v1126_v43 = vadd.f32 %v1118_v40, %v1079_v18  ;;  %975 = vst.msk [vmem:[#allocation3 + $0x20] sm:$0xff] %vm421_vm2, %v952_v41 }
 0x1d3   : > { %v1121_v44 = vld [vmem:[#allocation3 + $0x18] sm:$0xff]  ;;  %v2897_v45 = vpop.f32.mrf.mxu1 }
 0x1d4   : > { %v2911_v46 = vpop.f32.mrf.mxu0  ;;  %1134 = vst.msk [vmem:[#allocation3] sm:$0xff] %vm421_vm2, %v1126_v43  ;;  %v1129_v47 = vadd.f32 %v2905_v35, %v1121_v44  ;;  %978 = vst.msk [vmem:[#allocation3 + $0x38] sm:$0xff] %vm421_vm2, %v2897_v45 }
 0x1d5   : > { %v1120_v48 = vld [vmem:[#allocation3 + $0x10] sm:$0xff]  ;;  %v962_v49 = vpop.f32.mrf.mxu1 }
 0x1d6   : > { %v1109_v50 = vpop.f32.mrf.mxu0  ;;  %1137 = vst.msk [vmem:[#allocation3 + $0x18] sm:$0xff] %vm421_vm2, %v1129_v47  ;;  %v1128_v51 = vadd.f32 %v1120_v48, %v1089_v37  ;;  %977 = vst.msk [vmem:[#allocation3 + $0x30] sm:$0xff] %vm421_vm2, %v962_v49 }
 0x1d7   : > { %v1123_v52 = vld [vmem:[#allocation3 + $0x28] sm:$0xff]  ;;  %v2916_v53 = vpop.f32.mrf.mxu1 }
 0x1d8   : > { %v2930_v54 = vpop.f32.mrf.mxu0  ;;  %1136 = vst.msk [vmem:[#allocation3 + $0x10] sm:$0xff] %vm421_vm2, %v1128_v51  ;;  %v1131_v55 = vadd.f32 %v2908_v39, %v1123_v52 }
 0x1d9   : > { %v1122_v56 = vld [vmem:[#allocation3 + $0x20] sm:$0xff]  ;;  %v1282_v57 = vld [vmem:[#allocation3 + $0x8] sm:$0xff]  ;;  %v1242_v58 = vpop.f32.mrf.mxu1 }
 0x1da   : > { %v1405_v59 = vpop.f32.mrf.mxu0  ;;  %1139 = vst.msk [vmem:[#allocation3 + $0x28] sm:$0xff] %vm421_vm2, %v1131_v55  ;;  %v1130_v60 = vadd.f32 %v1122_v56, %v1099_v42  ;;  %v1290_v61 = vadd.f32 %v2916_v53, %v1282_v57 }
 0x1db   : > { %v1125_v62 = vld [vmem:[#allocation3 + $0x38] sm:$0xff]  ;;  %v1281_v63 = vld [vmem:[#allocation3] sm:$0xff]  ;;  %v2919_v0 = vpop.f32.mrf.mxu1 }
 0x1dc   : > { %v2933_v1 = vpop.f32.mrf.mxu0  ;;  %1138 = vst.msk [vmem:[#allocation3 + $0x20] sm:$0xff] %vm421_vm2, %v1130_v60  ;;  %v1133_v28 = vadd.f32 %v2911_v46, %v1125_v62  ;;  %1298 = vst.msk [vmem:[#allocation3 + $0x8] sm:$0xff] %vm421_vm2, %v1290_v61  ;;  %v1289_v29 = vadd.f32 %v1281_v63, %v1242_v58 }
 0x1dd   : > { %v1124_v2 = vld [vmem:[#allocation3 + $0x30] sm:$0xff]  ;;  %v1284_v3 = vld [vmem:[#allocation3 + $0x18] sm:$0xff]  ;;  %v1252_v4 = vpop.f32.mrf.mxu1 }
 0x1de   : > { %v1415_v5 = vpop.f32.mrf.mxu0  ;;  %1141 = vst.msk [vmem:[#allocation3 + $0x38] sm:$0xff] %vm421_vm2, %v1133_v28  ;;  %v1132_v6 = vadd.f32 %v1124_v2, %v1109_v50  ;;  %1297 = vst.msk [vmem:[#allocation3] sm:$0xff] %vm421_vm2, %v1289_v29  ;;  %v1292_v7 = vadd.f32 %v2919_v0, %v1284_v3 }
 0x1df   : > { %v1283_v8 = vld [vmem:[#allocation3 + $0x10] sm:$0xff]  ;;  %v2922_v9 = vpop.f32.mrf.mxu1 }
 0x1e0   : > { %v2936_v10 = vpop.f32.mrf.mxu0  ;;  %1140 = vst.msk [vmem:[#allocation3 + $0x30] sm:$0xff] %vm421_vm2, %v1132_v6  ;;  %1300 = vst.msk [vmem:[#allocation3 + $0x18] sm:$0xff] %vm421_vm2, %v1292_v7  ;;  %v1291_v11 = vadd.f32 %v1283_v8, %v1252_v4 }
 0x1e1   : > { %v1286_v12 = vld [vmem:[#allocation3 + $0x28] sm:$0xff]  ;;  %v1262_v14 = vpop.f32.mrf.mxu1 }
 0x1e2   : > { %v1425_v22 = vpop.f32.mrf.mxu0  ;;  %1299 = vst.msk [vmem:[#allocation3 + $0x10] sm:$0xff] %vm421_vm2, %v1291_v11  ;;  %v1294_v23 = vadd.f32 %v2922_v9, %v1286_v12 }
 0x1e3   : > { %v1445_v24 = vld [vmem:[#allocation3 + $0x8] sm:$0xff]  ;;  %v1285_v25 = vld [vmem:[#allocation3 + $0x20] sm:$0xff]  ;;  %v2925_v26 = vpop.f32.mrf.mxu1 }
 0x1e4   : > { %v2939_v27 = vpop.f32.mrf.mxu0  ;;  %v1453_v30 = vadd.f32 %v2930_v54, %v1445_v24  ;;  %1302 = vst.msk [vmem:[#allocation3 + $0x28] sm:$0xff] %vm421_vm2, %v1294_v23  ;;  %v1293_v31 = vadd.f32 %v1285_v25, %v1262_v14 }
 0x1e5   : > { %v1444_v32 = vld [vmem:[#allocation3] sm:$0xff]  ;;  %v1288_v33 = vld [vmem:[#allocation3 + $0x38] sm:$0xff]  ;;  %v1272_v34 = vpop.f32.mrf.mxu1 }
 0x1e6   : > { %v1435_v13 = vpop.f32.mrf.mxu0  ;;  %1461 = vst.msk [vmem:[#allocation3 + $0x8] sm:$0xff] %vm421_vm2, %v1453_v30  ;;  %v1452_v15 = vadd.f32 %v1444_v32, %v1405_v59  ;;  %1301 = vst.msk [vmem:[#allocation3 + $0x20] sm:$0xff] %vm421_vm2, %v1293_v31  ;;  %v1296_v16 = vadd.f32 %v2925_v26, %v1288_v33 }
 0x1e7   : > { %v1447_v17 = vld [vmem:[#allocation3 + $0x18] sm:$0xff]  ;;  %v1287_v18 = vld [vmem:[#allocation3 + $0x30] sm:$0xff]  ;;  %v2944_v19 = vpop.f32.mrf.mxu1 }
 0x1e8   : > { %v2958_v35 = vpop.f32.mrf.mxu0  ;;  %1460 = vst.msk [vmem:[#allocation3] sm:$0xff] %vm421_vm2, %v1452_v15  ;;  %v1455_v36 = vadd.f32 %v2933_v1, %v1447_v17  ;;  %1304 = vst.msk [vmem:[#allocation3 + $0x38] sm:$0xff] %vm421_vm2, %v1296_v16  ;;  %v1295_v37 = vadd.f32 %v1287_v18, %v1272_v34 }
 0x1e9   : > { %v1446_v20 = vld [vmem:[#allocation3 + $0x10] sm:$0xff]  ;;  %v1568_v38 = vpop.f32.mrf.mxu1 }
 0x1ea   : > { %v1731_v39 = vpop.f32.mrf.mxu0  ;;  %1463 = vst.msk [vmem:[#allocation3 + $0x18] sm:$0xff] %vm421_vm2, %v1455_v36  ;;  %v1454_v21 = vadd.f32 %v1446_v20, %v1415_v5  ;;  %1303 = vst.msk [vmem:[#allocation3 + $0x30] sm:$0xff] %vm421_vm2, %v1295_v37 }
 0x1eb   : > { %v1449_v40 = vld [vmem:[#allocation3 + $0x28] sm:$0xff]  ;;  %v2947_v41 = vpop.f32.mrf.mxu1 }
 0x1ec   : > { %v2961_v42 = vpop.f32.mrf.mxu0  ;;  %1462 = vst.msk [vmem:[#allocation3 + $0x10] sm:$0xff] %vm421_vm2, %v1454_v21  ;;  %v1457_v43 = vadd.f32 %v2936_v10, %v1449_v40 }
 0x1ed   : > { %v1448_v44 = vld [vmem:[#allocation3 + $0x20] sm:$0xff]  ;;  %v1608_v45 = vld [vmem:[#allocation3 + $0x8] sm:$0xff]  ;;  %v1578_v46 = vpop.f32.mrf.mxu1 }
 0x1ee   : > { %v1741_v47 = vpop.f32.mrf.mxu0  ;;  %1465 = vst.msk [vmem:[#allocation3 + $0x28] sm:$0xff] %vm421_vm2, %v1457_v43  ;;  %v1456_v48 = vadd.f32 %v1448_v44, %v1425_v22  ;;  %v1616_v49 = vadd.f32 %v2944_v19, %v1608_v45 }
 0x1ef   : > { %v1451_v50 = vld [vmem:[#allocation3 + $0x38] sm:$0xff]  ;;  %v1607_v51 = vld [vmem:[#allocation3] sm:$0xff]  ;;  %v2950_v52 = vpop.f32.mrf.mxu1 }
 0x1f0   : > { %v2964_v53 = vpop.f32.mrf.mxu0  ;;  %1464 = vst.msk [vmem:[#allocation3 + $0x20] sm:$0xff] %vm421_vm2, %v1456_v48  ;;  %v1459_v54 = vadd.f32 %v2939_v27, %v1451_v50  ;;  %1624 = vst.msk [vmem:[#allocation3 + $0x8] sm:$0xff] %vm421_vm2, %v1616_v49  ;;  %v1615_v55 = vadd.f32 %v1607_v51, %v1568_v38 }
 0x1f1   : > { %v1450_v56 = vld [vmem:[#allocation3 + $0x30] sm:$0xff]  ;;  %v1610_v57 = vld [vmem:[#allocation3 + $0x18] sm:$0xff]  ;;  %v1588_v58 = vpop.f32.mrf.mxu1 }
 0x1f2   : > { %v1751_v59 = vpop.f32.mrf.mxu0  ;;  %1467 = vst.msk [vmem:[#allocation3 + $0x38] sm:$0xff] %vm421_vm2, %v1459_v54  ;;  %v1458_v60 = vadd.f32 %v1450_v56, %v1435_v13  ;;  %1623 = vst.msk [vmem:[#allocation3] sm:$0xff] %vm421_vm2, %v1615_v55  ;;  %v1618_v61 = vadd.f32 %v2947_v41, %v1610_v57 }
 0x1f3   : > { %v1609_v62 = vld [vmem:[#allocation3 + $0x10] sm:$0xff]  ;;  %v2953_v63 = vpop.f32.mrf.mxu1 }
 0x1f4   : > { %v2967_v0 = vpop.f32.mrf.mxu0  ;;  %1466 = vst.msk [vmem:[#allocation3 + $0x30] sm:$0xff] %vm421_vm2, %v1458_v60  ;;  %1626 = vst.msk [vmem:[#allocation3 + $0x18] sm:$0xff] %vm421_vm2, %v1618_v61  ;;  %v1617_v1 = vadd.f32 %v1609_v62, %v1578_v46 }
 0x1f5   : > { %v1612_v28 = vld [vmem:[#allocation3 + $0x28] sm:$0xff]  ;;  %v1598_v29 = vpop.f32.mrf.mxu1 }
 0x1f6   : > { %v1761_v2 = vpop.f32.mrf.mxu0  ;;  %1625 = vst.msk [vmem:[#allocation3 + $0x10] sm:$0xff] %vm421_vm2, %v1617_v1  ;;  %v1620_v3 = vadd.f32 %v2950_v52, %v1612_v28 }
 0x1f7   : > { %v1771_v4 = vld [vmem:[#allocation3 + $0x8] sm:$0xff]  ;;  %v1611_v5 = vld [vmem:[#allocation3 + $0x20] sm:$0xff]  ;;  %v2972_v6 = vpop.f32.mrf.mxu1 }
 0x1f8   : > { %v3633_v7 = vpop.f32.mrf.mxu0  ;;  %v1779_v8 = vadd.f32 %v2958_v35, %v1771_v4  ;;  %1628 = vst.msk [vmem:[#allocation3 + $0x28] sm:$0xff] %vm421_vm2, %v1620_v3  ;;  %v1619_v9 = vadd.f32 %v1611_v5, %v1588_v58 }
 0x1f9   : > { %v1770_v10 = vld [vmem:[#allocation3] sm:$0xff]  ;;  %v1614_v11 = vld [vmem:[#allocation3 + $0x38] sm:$0xff]  ;;  %v1895_v12 = vpop.f32.mrf.mxu1 }
 0x1fa   : > { %v3636_v14 = vpop.f32.mrf.mxu0  ;;  %1787 = vst.msk [vmem:[#allocation3 + $0x8] sm:$0xff] %vm421_vm2, %v1779_v8  ;;  %v1778_v22 = vadd.f32 %v1770_v10, %v1731_v39  ;;  %1627 = vst.msk [vmem:[#allocation3 + $0x20] sm:$0xff] %vm421_vm2, %v1619_v9  ;;  %v1622_v23 = vadd.f32 %v2953_v63, %v1614_v11 }
 0x1fb   : > { %v1773_v24 = vld [vmem:[#allocation3 + $0x18] sm:$0xff]  ;;  %v1613_v25 = vld [vmem:[#allocation3 + $0x30] sm:$0xff]  ;;  %v2975_v26 = vpop.f32.mrf.mxu1 }
 0x1fc   : > { %v3640_v27 = vpop.f32.mrf.mxu0  ;;  %1786 = vst.msk [vmem:[#allocation3] sm:$0xff] %vm421_vm2, %v1778_v22  ;;  %v1781_v30 = vadd.f32 %v2961_v42, %v1773_v24  ;;  %1630 = vst.msk [vmem:[#allocation3 + $0x38] sm:$0xff] %vm421_vm2, %v1622_v23  ;;  %v1621_v31 = vadd.f32 %v1613_v25, %v1598_v29 }
 0x1fd   : > { %v1772_v32 = vld [vmem:[#allocation3 + $0x10] sm:$0xff]  ;;  %v1905_v33 = vpop.f32.mrf.mxu1 }
 0x1fe   : > { %1789 = vst.msk [vmem:[#allocation3 + $0x18] sm:$0xff] %vm421_vm2, %v1781_v30  ;;  %v1780_v34 = vadd.f32 %v1772_v32, %v1741_v47  ;;  %1629 = vst.msk [vmem:[#allocation3 + $0x30] sm:$0xff] %vm421_vm2, %v1621_v31  ;;  %v2068_v15 = vpop.f32.mrf.mxu0 }
 0x1ff   : > { %v1775_v13 = vld [vmem:[#allocation3 + $0x28] sm:$0xff]  ;;  %v2978_v16 = vpop.f32.mrf.mxu1 }
 0x200   : > { %1788 = vst.msk [vmem:[#allocation3 + $0x10] sm:$0xff] %vm421_vm2, %v1780_v34  ;;  %v1783_v17 = vadd.f32 %v2964_v53, %v1775_v13  ;;  %v2992_v39 = vpop.f32.mrf.mxu0  ;;  %v3674_v13 = vld [vmem:[%s3772_s6] ss:$0 sm:$0xff] }
 0x201   : > { %v1774_v18 = vld [vmem:[#allocation3 + $0x20] sm:$0xff]  ;;  %v1935_v19 = vld [vmem:[#allocation3 + $0x8] sm:$0xff]  ;;  %v1915_v35 = vpop.f32.mrf.mxu1 }
 0x202   : > { %1791 = vst.msk [vmem:[#allocation3 + $0x28] sm:$0xff] %vm421_vm2, %v1783_v17  ;;  %v1782_v36 = vadd.f32 %v1774_v18, %v1751_v59  ;;  %v1943_v37 = vadd.f32 %v2972_v6, %v1935_v19  ;;  %v2078_v48 = vpop.f32.mrf.mxu0  ;;  %v2708_v19 = vld [vmem:[%s3770_s4] ss:$0 sm:$0xff] }
 0x203   : > { %v1777_v20 = vld [vmem:[#allocation3 + $0x38] sm:$0xff]  ;;  %v1934_v38 = vld [vmem:[#allocation3] sm:$0xff]  ;;  %v2981_v21 = vpop.f32.mrf.mxu1 }
 0x204   : > { %1790 = vst.msk [vmem:[#allocation3 + $0x20] sm:$0xff] %vm421_vm2, %v1782_v36  ;;  %v1785_v40 = vadd.f32 %v2967_v0, %v1777_v20  ;;  %1951 = vst.msk [vmem:[#allocation3 + $0x8] sm:$0xff] %vm421_vm2, %v1943_v37  ;;  %v1942_v41 = vadd.f32 %v1934_v38, %v1895_v12  ;;  %v2995_v52 = vpop.f32.mrf.mxu0 }
 0x205   : > { %v1776_v42 = vld [vmem:[#allocation3 + $0x30] sm:$0xff]  ;;  %v1937_v43 = vld [vmem:[#allocation3 + $0x18] sm:$0xff]  ;;  %v1925_v44 = vpop.f32.mrf.mxu1 }
 0x206   : > { %1793 = vst.msk [vmem:[#allocation3 + $0x38] sm:$0xff] %vm421_vm2, %v1785_v40  ;;  %v1784_v45 = vadd.f32 %v1776_v42, %v1761_v2  ;;  %1950 = vst.msk [vmem:[#allocation3] sm:$0xff] %vm421_vm2, %v1942_v41  ;;  %v1945_v46 = vadd.f32 %v2975_v26, %v1937_v43  ;;  %v2088_v61 = vpop.f32.mrf.mxu0 }
 0x207   : > { %v1936_v47 = vld [vmem:[#allocation3 + $0x10] sm:$0xff]  ;;  %v3000_v51 = vpop.f32.mrf.mxu1 }
 0x208   : > { %1792 = vst.msk [vmem:[#allocation3 + $0x30] sm:$0xff] %vm421_vm2, %v1784_v45  ;;  %1953 = vst.msk [vmem:[#allocation3 + $0x18] sm:$0xff] %vm421_vm2, %v1945_v46  ;;  %v1944_v49 = vadd.f32 %v1936_v47, %v1905_v33  ;;  %v3016_v28 = vpop.f32.mrf.mxu0 }
 0x209   : > { %v1939_v50 = vld [vmem:[#allocation3 + $0x28] sm:$0xff]  ;;  %v2221_v60 = vpop.f32.mrf.mxu1  ;;  %v2400_v36 = vadd.f32 %v3016_v28, %v3674_v13 }
 0x20a   : > { %1952 = vst.msk [vmem:[#allocation3 + $0x10] sm:$0xff] %vm421_vm2, %v1944_v49  ;;  %v1947_v53 = vadd.f32 %v2978_v16, %v1939_v50 }
 0x20b   : > { %v2098_v54 = vld [vmem:[#allocation3 + $0x8] sm:$0xff]  ;;  %v1938_v55 = vld [vmem:[#allocation3 + $0x20] sm:$0xff]  ;;  %v3003_v4 = vpop.f32.mrf.mxu1 }
 0x20c   : > { %v2106_v56 = vadd.f32 %v3633_v7, %v2098_v54  ;;  %1955 = vst.msk [vmem:[#allocation3 + $0x28] sm:$0xff] %vm421_vm2, %v1947_v53  ;;  %v1946_v57 = vadd.f32 %v1938_v55, %v1915_v35  ;;  %v2394_v7 = vpop.f32.mrf.mxu0 }
 0x20d   : > { %v2097_v58 = vld [vmem:[#allocation3] sm:$0xff]  ;;  %v1941_v59 = vld [vmem:[#allocation3 + $0x38] sm:$0xff]  ;;  %v2231_v11 = vpop.f32.mrf.mxu1  ;;  %v2395_v42 = vadd.f32 %v3674_v13, %v2394_v7 }
 0x20e   : > { %2114 = vst.msk [vmem:[#allocation3 + $0x8] sm:$0xff] %vm421_vm2, %v2106_v56  ;;  %v2105_v62 = vadd.f32 %v2097_v58, %v3636_v14  ;;  %1954 = vst.msk [vmem:[#allocation3 + $0x20] sm:$0xff] %vm421_vm2, %v1946_v57  ;;  %v1949_v63 = vadd.f32 %v2981_v21, %v1941_v59  ;;  %v3019_v24 = vpop.f32.mrf.mxu0 }
 0x20f   : > { %v2100_v0 = vld [vmem:[#allocation3 + $0x18] sm:$0xff]  ;;  %v1940_v1 = vld [vmem:[#allocation3 + $0x30] sm:$0xff]  ;;  %v3006_v30 = vpop.f32.mrf.mxu1  ;;  %v2410_v47 = vadd.f32 %v3019_v24, %v3674_v13 }
 0x210   : > { %2113 = vst.msk [vmem:[#allocation3] sm:$0xff] %vm421_vm2, %v2105_v62  ;;  %v2108_v29 = vadd.f32 %v3640_v27, %v2100_v0  ;;  %1957 = vst.msk [vmem:[#allocation3 + $0x38] sm:$0xff] %vm421_vm2, %v1949_v63  ;;  %v1948_v2 = vadd.f32 %v1940_v1, %v1925_v44 }
 0x211   : > { %v2099_v3 = vld [vmem:[#allocation3 + $0x10] sm:$0xff]  ;;  %v2241_v18 = vpop.f32.mrf.mxu1 }
 0x212   : > { %2116 = vst.msk [vmem:[#allocation3 + $0x18] sm:$0xff] %vm421_vm2, %v2108_v29  ;;  %v2107_v5 = vadd.f32 %v2099_v3, %v2068_v15  ;;  %1956 = vst.msk [vmem:[#allocation3 + $0x30] sm:$0xff] %vm421_vm2, %v1948_v2  ;;  %v2404_v15 = vpop.f32.mrf.mxu0 }
 0x213   : > { %v2102_v6 = vld [vmem:[#allocation3 + $0x28] sm:$0xff]  ;;  %v3009_v38 = vpop.f32.mrf.mxu1  ;;  %v2405_v56 = vadd.f32 %v3674_v13, %v2404_v15 }
 0x214   : > { %2115 = vst.msk [vmem:[#allocation3 + $0x10] sm:$0xff] %vm421_vm2, %v2107_v5  ;;  %v2110_v8 = vadd.f32 %v2992_v39, %v2102_v6  ;;  %v3022_v39 = vpop.f32.mrf.mxu0 }
 0x215   : > { %v2101_v9 = vld [vmem:[#allocation3 + $0x20] sm:$0xff]  ;;  %v2261_v10 = vld [vmem:[#allocation3 + $0x8] sm:$0xff] }
 0x216   : > { %2118 = vst.msk [vmem:[#allocation3 + $0x28] sm:$0xff] %vm421_vm2, %v2110_v8  ;;  %v2109_v12 = vadd.f32 %v2101_v9, %v2078_v48  ;;  %v2269_v14 = vadd.f32 %v3000_v51, %v2261_v10  ;;  %v2251_v48 = vpop.f32.mrf.mxu1  ;;  %v2414_v51 = vpop.f32.mrf.mxu0 }
 0x217   : > { %v2260_v22 = vld [vmem:[#allocation3] sm:$0xff]  ;;  %v2104_v23 = vld [vmem:[#allocation3 + $0x38] sm:$0xff]  ;;  %v2415_v29 = vadd.f32 %v3674_v13, %v2414_v51 }
 0x218   : > { %2117 = vst.msk [vmem:[#allocation3 + $0x20] sm:$0xff] %vm421_vm2, %v2109_v12  ;;  %2277 = vst.msk [vmem:[#allocation3 + $0x8] sm:$0xff] %vm421_vm2, %v2269_v14  ;;  %v2268_v25 = vadd.f32 %v2260_v22, %v2221_v60  ;;  %v2112_v26 = vadd.f32 %v2995_v52, %v2104_v23  ;;  %v3025_v63 = vpop.f32.mrf.mxu0 }
 0x219   : > { %v2263_v27 = vld [vmem:[#allocation3 + $0x18] sm:$0xff]  ;;  %v2103_v31 = vld [vmem:[#allocation3 + $0x30] sm:$0xff]  ;;  %v2430_v6 = vadd.f32 %v3025_v63, %v3674_v13 }
 0x21a   : > { %2276 = vst.msk [vmem:[#allocation3] sm:$0xff] %vm421_vm2, %v2268_v25  ;;  %v2271_v32 = vadd.f32 %v3003_v4, %v2263_v27  ;;  %2120 = vst.msk [vmem:[#allocation3 + $0x38] sm:$0xff] %vm421_vm2, %v2112_v26  ;;  %v2111_v33 = vadd.f32 %v2103_v31, %v2088_v61  ;;  %v2420_v61 = vadd.f32 %v3022_v39, %v3674_v13  ;;  %v2424_v8 = vpop.f32.mrf.mxu0 }
 0x21b   : > { %v2262_v34 = vld [vmem:[#allocation3 + $0x10] sm:$0xff]  ;;  %v2425_v23 = vadd.f32 %v3674_v13, %v2424_v8 }
 0x21c   : > { %2279 = vst.msk [vmem:[#allocation3 + $0x18] sm:$0xff] %vm421_vm2, %v2271_v32  ;;  %v2270_v16 = vadd.f32 %v2262_v34, %v2231_v11  ;;  %2119 = vst.msk [vmem:[#allocation3 + $0x30] sm:$0xff] %vm421_vm2, %v2111_v33 }
 0x21d   : > { %v2265_v17 = vld [vmem:[#allocation3 + $0x28] sm:$0xff] }
 0x21e   : > { %2278 = vst.msk [vmem:[#allocation3 + $0x10] sm:$0xff] %vm421_vm2, %v2270_v16  ;;  %v2273_v35 = vadd.f32 %v3006_v30, %v2265_v17 }
 0x21f   : > { %v2264_v37 = vld [vmem:[#allocation3 + $0x20] sm:$0xff]  ;;  %v2434_v20 = vld [vmem:[#allocation3 + $0x8] sm:$0xff] }
 0x220   : > { %2281 = vst.msk [vmem:[#allocation3 + $0x28] sm:$0xff] %vm421_vm2, %v2273_v35  ;;  %v2272_v21 = vadd.f32 %v2264_v37, %v2241_v18  ;;  %v2449_v40 = vadd.f32 %v2708_v19, %v2434_v20 }
 0x221   : > { %v2267_v41 = vld [vmem:[#allocation3 + $0x38] sm:$0xff]  ;;  %v2433_v43 = vld [vmem:[#allocation3] sm:$0xff] }
 0x222   : > { %2280 = vst.msk [vmem:[#allocation3 + $0x20] sm:$0xff] %vm421_vm2, %v2272_v21  ;;  %v2457_v44 = vadd.f32 %v2449_v40, %v2400_v36  ;;  %v2275_v45 = vadd.f32 %v3009_v38, %v2267_v41  ;;  %v2448_v46 = vadd.f32 %v2708_v19, %v2433_v43 }
 0x223   : > { %v2266_v49 = vld [vmem:[#allocation3 + $0x30] sm:$0xff]  ;;  %v2436_v50 = vld [vmem:[#allocation3 + $0x18] sm:$0xff] }
 0x224   : > { %v2465_v52 = vmax.f32 %v2457_v44, 0.0  ;;  %2283 = vst.msk [vmem:[#allocation3 + $0x38] sm:$0xff] %vm421_vm2, %v2275_v45  ;;  %v2456_v53 = vadd.f32 %v2448_v46, %v2395_v42  ;;  %v2274_v54 = vadd.f32 %v2266_v49, %v2251_v48  ;;  %v2451_v55 = vadd.f32 %v2708_v19, %v2436_v50 }
 0x225   : > { %v2435_v57 = vld [vmem:[#allocation3 + $0x10] sm:$0xff] }
 0x226   : > { %2473 = vst.msk [vmem:[%s3692_s18 + $0x8] sm:$0xff] %vm421_vm2, %v2465_v52  ;;  %v2464_v58 = vmax.f32 %v2456_v53, 0.0  ;;  %2282 = vst.msk [vmem:[#allocation3 + $0x30] sm:$0xff] %vm421_vm2, %v2274_v54  ;;  %v2459_v59 = vadd.f32 %v2451_v55, %v2410_v47  ;;  %v2450_v60 = vadd.f32 %v2708_v19, %v2435_v57 }
 0x227   : > { %v2438_v62 = vld [vmem:[#allocation3 + $0x28] sm:$0xff] }
 0x228   : > { %2472 = vst.msk [vmem:[%s3692_s18] sm:$0xff] %vm421_vm2, %v2464_v58  ;;  %v2467_v0 = vmax.f32 %v2459_v59, 0.0  ;;  %v2458_v1 = vadd.f32 %v2450_v60, %v2405_v56  ;;  %v2453_v28 = vadd.f32 %v2708_v19, %v2438_v62 }
 0x229   : > { %v2437_v2 = vld [vmem:[#allocation3 + $0x20] sm:$0xff] }
 0x22a   : > { %2475 = vst.msk [vmem:[%s3692_s18 + $0x18] sm:$0xff] %vm421_vm2, %v2467_v0  ;;  %v2466_v3 = vmax.f32 %v2458_v1, 0.0  ;;  %v2461_v4 = vadd.f32 %v2453_v28, %v2420_v61  ;;  %v2452_v5 = vadd.f32 %v2708_v19, %v2437_v2 }
 0x22b   : > { %v2440_v7 = vld [vmem:[#allocation3 + $0x38] sm:$0xff] }
 0x22c   : > { %2474 = vst.msk [vmem:[%s3692_s18 + $0x10] sm:$0xff] %vm421_vm2, %v2466_v3  ;;  %v2469_v9 = vmax.f32 %v2461_v4, 0.0  ;;  %v2460_v10 = vadd.f32 %v2452_v5, %v2415_v29  ;;  %v2455_v11 = vadd.f32 %v2708_v19, %v2440_v7 }
 0x22d   : > { %v2439_v12 = vld [vmem:[#allocation3 + $0x30] sm:$0xff] }
 0x22e   : > { %2477 = vst.msk [vmem:[%s3692_s18 + $0x28] sm:$0xff] %vm421_vm2, %v2469_v9  ;;  %v2468_v14 = vmax.f32 %v2460_v10, 0.0  ;;  %v2463_v22 = vadd.f32 %v2455_v11, %v2430_v6  ;;  %v2454_v24 = vadd.f32 %v2708_v19, %v2439_v12 }
 0x230   : > { %2476 = vst.msk [vmem:[%s3692_s18 + $0x20] sm:$0xff] %vm421_vm2, %v2468_v14  ;;  %v2471_v25 = vmax.f32 %v2463_v22, 0.0  ;;  %v2462_v26 = vadd.f32 %v2454_v24, %v2425_v23 }
 0x232   : > { %2479 = vst.msk [vmem:[%s3692_s18 + $0x38] sm:$0xff] %vm421_vm2, %v2471_v25  ;;  %v2470_v27 = vmax.f32 %v2462_v26, 0.0 }
 0x234   : > { %2478 = vst.msk [vmem:[%s3692_s18 + $0x30] sm:$0xff] %vm421_vm2, %v2470_v27 }
 0x235   : > { %3086 = shalt.err (!%p3083_p3)
}
 0x236   : > { %s3087_s14 = scalar_lea.hbm %s3716_s23, 1024  ;;  %s3091_s17 = scalar_lea.hbm %s3773_s7, 2048 }
 0x237   : > { %p3088_p4 = scmp.ne.s32.totalorder %s3716_s23, %s3087_s14  ;;  %p3092_p9 = scmp.lt.s32.totalorder %s3716_s23, %s3773_s7 }
 0x238   : > { %p3093_p10 = scmp.lt.s32.totalorder %s3091_s17, %s3087_s14 }
 0x239   : > { %p3089_p7 = pnand %p3088_p4, %p3217_p5 }
 0x23a   : > { %p3094_p11 = por %p3093_p10, %p3092_p9 }
 0x23b   : > { %p3090_p8 = pneg %p3089_p7 }
 0x23d   : > { %p3095_p12 = pnand %p3094_p11, %p3090_p8 }
 0x23f   : > { %3098 = shalt.err (!%p3095_p12)
}
 0x240   : > { %s3137_s21 = smov 128   ;;  %s3138_s22 = smov 8  }
 0x241   : > { %3031 = dma.vmem_to_hbm [thread:$0]  (%p3217_p5), %s3718_s20, 1024, %s3716_s23, %s3726_s28, %s3137_s21, %s3137_s21, %s3138_s22  }
 0x242 PF: > { %p3037_p13 = scmp.ge.s32.totalorder %s3133_s27, 2  ;;  %s2509_s29 = sand.u32 1, %s3121_s24  }
 0x243   : > { %s2510_s8 = scalar_lea.sflag [#allocation6], %s2509_s29 }
 0x244   : > { %p3034_p0 = pnand %p3037_p13, %p3221_p6 }
 0x246   : > { %p3035_p1 = pneg %p3034_p0 }
 0x248   : > { %3116 = dma.done.wait (%p3035_p1), %s2510_s8, 1024  }
 0x249   : > { %3118 = vsyncadd (%p3035_p1), %s2510_s8, 4294966272  ;;  %p17_p2 = scmp.ge.s32.totalorder %s3204_s30, 4   ;;  %s3776_s24 = smov %s3125_s25 }
 0x24a   : > { %s3777_s25 = smov %s3129_s26  ;;  %s3778_s26 = smov %s3215_s10 }
 0x24b   : > { %s3779_s27 = smov %s3204_s30  ;;  %19 = sbr.rel (!%p17_p2) target bundleno = 3 (0x3), region = 98 }
 0x250   :  { %2515 = vsyncpa [#allocation6], 1 }
 0x251   :  { %2517 = vsyncpa [#allocation6 + $0x1], 1 }

</bundles_post_ra>
